<compile_context>
chip_gen: v6e
topology: v6e:2x2x1
jax: 0.10.0
libtpu: 0.0.40
codegen_flags: <defaults>
</compile_context>

<pallas_src>
import functools
import math

import numpy as np
import jax
import jax.numpy as jnp
from jax import lax
from jax.experimental import pallas as pl
from jax.experimental.pallas import tpu as pltpu

# ~2 MiB (f32) per block => in+out, double-buffered = 8 MiB of VMEM: safe
# under the default scoped limit on v5e (16 MiB), v6e (32 MiB), v7x (32 MiB).
_TARGET_BLOCK_ELEMS = 512 * 1024

# lowbias32 constants, written as signed 32-bit so all integer math stays int32.
_C1 = np.int32(0x7FEB352D)
_C2 = np.int32(0x846CA68B - (1 << 32))
_GOLDEN = np.int32(0x9E3779B9 - (1 << 32))

# Giles (2010) single-precision erfinv polynomial coefficients.
_ERFINV_CENTRAL = (2.81022636e-08, 3.43273939e-07, -3.5233877e-06,
                   -4.39150654e-06, 0.00021858087, -0.00125372503,
                   -0.00417768164, 0.246640727, 1.50140941)
_ERFINV_TAIL = (-0.000200214257, 0.000100950558, 0.00134934322,
                -0.00367342844, 0.00573950773, -0.0076224613,
                0.00943887047, 1.00167406, 2.83297682)


def _lshr(h, k):
    """Logical right shift for int32 values (arithmetic shift + mask)."""
    return (h >> k) & np.int32((1 << (32 - k)) - 1)


def _hash32(h):
    """lowbias32: high-avalanche integer permutation (counter-based RNG)."""
    h = h ^ _lshr(h, 16)
    h = h * _C1
    h = h ^ _lshr(h, 15)
    h = h * _C2
    h = h ^ _lshr(h, 16)
    return h


def _poly(t, coeffs):
    p = np.float32(coeffs[0])
    for c in coeffs[1:]:
        p = p * t + np.float32(c)
    return p


def _gaussian_dropout_kernel(seed_ref, x_ref, o_ref, *, sigma):
    """out = x * (z * sigma + 1), z ~ N(0,1), on one (block_rows, W) tile."""
    br, bw = x_ref.shape

    # Global element index for every position of this block (int32 counters).
    row = lax.broadcasted_iota(jnp.int32, (br, bw), 0) + pl.program_id(0) * br
    col = lax.broadcasted_iota(jnp.int32, (br, bw), 1)
    gidx = row * bw + col

    # One 32-bit draw per element, keyed by the (mixed) user seed.
    key = _hash32(seed_ref[0] ^ _GOLDEN)
    bits = _hash32(gidx ^ key)

    # Top 24 bits -> uniform in (0, 1), symmetric about 0.5 (never hits 0 or 1).
    mant = _lshr(bits, 8).astype(jnp.float32)                  # [0, 2^24)
    u = (mant + np.float32(0.5)) * np.float32(2.0 ** -24)

    # Standard normal via the inverse CDF: z = sqrt(2) * erfinv(2u - 1).
    t = 2.0 * u - 1.0                                          # (-1, 1)
    w = jnp.maximum(-jnp.log((1.0 - t) * (1.0 + t)), np.float32(0.0))
    p_central = _poly(w - 2.5, _ERFINV_CENTRAL)
    p_tail = _poly(jnp.sqrt(w) - 3.0, _ERFINV_TAIL)
    z = np.float32(math.sqrt(2.0)) * jnp.where(w < 5.0, p_central, p_tail) * t

    eps = z * np.float32(sigma) + np.float32(1.0)              # eps ~ N(1, sigma^2)
    o_ref[...] = (x_ref[...].astype(jnp.float32) * eps).astype(o_ref.dtype)


def _choose_lane_width(total):
    """Largest lane-dense width (multiple of 128) that divides `total`."""
    for w in (4096, 2048, 1024, 512, 256, 128):
        if total % w == 0:
            return w
    return 0  # ragged size -> caller pads


def gaussian_dropout(x, dropout, seed, training=True):
    """JAX/Pallas equivalent of GaussianDropout.forward."""
    if not training:
        return x

    # d = sigmoid(dropout); sigma = d / (1 - d)   (dropout is a Python scalar)
    d = 1.0 / (1.0 + math.exp(-float(dropout)))
    sigma = d / (1.0 - d)

    orig_shape = x.shape
    orig_dtype = x.dtype
    total = int(x.size)

    flat = x.reshape(-1)
    lane_w = _choose_lane_width(total)
    if lane_w == 0:
        # Rare ragged path: pad up to a lane-dense width (one extra copy).
        lane_w = 1024
        padded = pl.cdiv(total, lane_w) * lane_w
        flat = jnp.pad(flat, (0, padded - total))
    else:
        padded = total

    rows = padded // lane_w
    target_rows = max(8, (_TARGET_BLOCK_ELEMS // lane_w) // 8 * 8)
    block_rows = min(rows, target_rows)  # == rows (full dim) or a multiple of 8
    grid = (pl.cdiv(rows, block_rows),)

    x2d = flat.reshape(rows, lane_w)

    grid_spec = pltpu.PrefetchScalarGridSpec(
        num_scalar_prefetch=1,
        grid=grid,
        in_specs=[pl.BlockSpec((block_rows, lane_w), lambda i, seed_ref: (i, 0))],
        out_specs=pl.BlockSpec((block_rows, lane_w), lambda i, seed_ref: (i, 0)),
    )

    out2d = pl.pallas_call(
        functools.partial(_gaussian_dropout_kernel, sigma=sigma),
        out_shape=jax.ShapeDtypeStruct((rows, lane_w), orig_dtype),
        grid_spec=grid_spec,
        compiler_params=pltpu.CompilerParams(
            dimension_semantics=("parallel",)),
    )(jnp.asarray([seed], dtype=jnp.int32), x2d)

    if padded != total:
        return out2d.reshape(-1)[:total].reshape(orig_shape)
    return out2d.reshape(orig_shape)


if __name__ == "__main__":
    key = jax.random.PRNGKey(0)
    # Small NCHW input, matching the conv activations this module typically wraps.
    x = jax.random.normal(key, (2, 4, 16, 16), dtype=jnp.float32)
    dropout = 0.3  # module's __init__ scalar (pre-sigmoid), deterministic

    out = gaussian_dropout(x, dropout, seed=1234, training=True)
    out = jax.block_until_ready(out)

    assert out.shape == x.shape and out.dtype == x.dtype
    assert bool(jnp.all(jnp.isfinite(out)))
    # Multiplicative noise with sigma ~= 1.35 must actually perturb the input.
    assert float(jnp.std(out - x)) > 0.1

    # Eval mode is identity.
    out_eval = gaussian_dropout(x, dropout, seed=1234, training=False)
    out_eval = jax.block_until_ready(out_eval)
    assert jnp.array_equal(out_eval, x)

    print("KERNEL_OK")
</pallas_src>

<mosaic_0001>
module attributes {stable_mosaic.version = 11 : i64} {
  func.func @_gaussian_dropout_kernel(%arg0: i32, %arg1: memref<1xi32, #tpu.memory_space<smem>>, %arg2: memref<1x2048xf32, #tpu.memory_space<vmem>>, %arg3: memref<1x2048xf32, #tpu.memory_space<vmem>>) attributes {dimension_semantics = [#tpu.dimension_semantics<parallel>], iteration_bounds = array<i64: 1>, scalar_prefetch = 1 : i64, scratch_operands = 0 : i64, tpu.core_type = #tpu.core_type<tc>, window_params = [{transform_indices = @transform_0, window_bounds = array<i64: 1, 2048>}, {transform_indices = @transform_1, window_bounds = array<i64: 1, 2048>}]} {
    %0 = tpu.iota {dimensions = array<i32: 0>} : vector<1x2048xi32>
    %c1_i32 = arith.constant 1 : i32
    %1 = arith.muli %arg0, %c1_i32 : i32
    %2 = vector.broadcast %1 : i32 to vector<1x2048xi32>
    %3 = arith.addi %0, %2 : vector<1x2048xi32>
    %4 = tpu.iota {dimensions = array<i32: 1>} : vector<1x2048xi32>
    %c2048_i32 = arith.constant 2048 : i32
    %5 = vector.broadcast %c2048_i32 : i32 to vector<1x2048xi32>
    %6 = arith.muli %3, %5 : vector<1x2048xi32>
    %7 = arith.addi %6, %4 : vector<1x2048xi32>
    %c0 = arith.constant 0 : index
    %8 = memref.load %arg1[%c0] : memref<1xi32, #tpu.memory_space<smem>>
    %c-1640531527_i32 = arith.constant -1640531527 : i32
    %9 = arith.xori %8, %c-1640531527_i32 : i32
    %c16_i32 = arith.constant 16 : i32
    %10 = arith.shrsi %9, %c16_i32 : i32
    %c65535_i32 = arith.constant 65535 : i32
    %11 = arith.andi %10, %c65535_i32 : i32
    %12 = arith.xori %9, %11 : i32
    %c2146121005_i32 = arith.constant 2146121005 : i32
    %13 = arith.muli %12, %c2146121005_i32 : i32
    %c15_i32 = arith.constant 15 : i32
    %14 = arith.shrsi %13, %c15_i32 : i32
    %c131071_i32 = arith.constant 131071 : i32
    %15 = arith.andi %14, %c131071_i32 : i32
    %16 = arith.xori %13, %15 : i32
    %c-2073254261_i32 = arith.constant -2073254261 : i32
    %17 = arith.muli %16, %c-2073254261_i32 : i32
    %c16_i32_0 = arith.constant 16 : i32
    %18 = arith.shrsi %17, %c16_i32_0 : i32
    %c65535_i32_1 = arith.constant 65535 : i32
    %19 = arith.andi %18, %c65535_i32_1 : i32
    %20 = arith.xori %17, %19 : i32
    %21 = vector.broadcast %20 : i32 to vector<1x2048xi32>
    %22 = arith.xori %7, %21 : vector<1x2048xi32>
    %c16_i32_2 = arith.constant 16 : i32
    %23 = vector.broadcast %c16_i32_2 : i32 to vector<1x2048xi32>
    %24 = arith.shrsi %22, %23 : vector<1x2048xi32>
    %c65535_i32_3 = arith.constant 65535 : i32
    %25 = vector.broadcast %c65535_i32_3 : i32 to vector<1x2048xi32>
    %26 = arith.andi %24, %25 : vector<1x2048xi32>
    %27 = arith.xori %22, %26 : vector<1x2048xi32>
    %c2146121005_i32_4 = arith.constant 2146121005 : i32
    %28 = vector.broadcast %c2146121005_i32_4 : i32 to vector<1x2048xi32>
    %29 = arith.muli %27, %28 : vector<1x2048xi32>
    %c15_i32_5 = arith.constant 15 : i32
    %30 = vector.broadcast %c15_i32_5 : i32 to vector<1x2048xi32>
    %31 = arith.shrsi %29, %30 : vector<1x2048xi32>
    %c131071_i32_6 = arith.constant 131071 : i32
    %32 = vector.broadcast %c131071_i32_6 : i32 to vector<1x2048xi32>
    %33 = arith.andi %31, %32 : vector<1x2048xi32>
    %34 = arith.xori %29, %33 : vector<1x2048xi32>
    %c-2073254261_i32_7 = arith.constant -2073254261 : i32
    %35 = vector.broadcast %c-2073254261_i32_7 : i32 to vector<1x2048xi32>
    %36 = arith.muli %34, %35 : vector<1x2048xi32>
    %c16_i32_8 = arith.constant 16 : i32
    %37 = vector.broadcast %c16_i32_8 : i32 to vector<1x2048xi32>
    %38 = arith.shrsi %36, %37 : vector<1x2048xi32>
    %c65535_i32_9 = arith.constant 65535 : i32
    %39 = vector.broadcast %c65535_i32_9 : i32 to vector<1x2048xi32>
    %40 = arith.andi %38, %39 : vector<1x2048xi32>
    %41 = arith.xori %36, %40 : vector<1x2048xi32>
    %c8_i32 = arith.constant 8 : i32
    %42 = vector.broadcast %c8_i32 : i32 to vector<1x2048xi32>
    %43 = arith.shrsi %41, %42 : vector<1x2048xi32>
    %c16777215_i32 = arith.constant 16777215 : i32
    %44 = vector.broadcast %c16777215_i32 : i32 to vector<1x2048xi32>
    %45 = arith.andi %43, %44 : vector<1x2048xi32>
    %46 = arith.sitofp %45 : vector<1x2048xi32> to vector<1x2048xf32>
    %cst = arith.constant 5.000000e-01 : f32
    %47 = vector.broadcast %cst : f32 to vector<1x2048xf32>
    %48 = arith.addf %46, %47 : vector<1x2048xf32>
    %cst_10 = arith.constant 5.96046448E-8 : f32
    %49 = vector.broadcast %cst_10 : f32 to vector<1x2048xf32>
    %50 = arith.mulf %48, %49 : vector<1x2048xf32>
    %cst_11 = arith.constant 2.000000e+00 : f32
    %51 = vector.broadcast %cst_11 : f32 to vector<1x2048xf32>
    %52 = arith.mulf %51, %50 : vector<1x2048xf32>
    %cst_12 = arith.constant 1.000000e+00 : f32
    %53 = vector.broadcast %cst_12 : f32 to vector<1x2048xf32>
    %54 = arith.subf %52, %53 : vector<1x2048xf32>
    %cst_13 = arith.constant 1.000000e+00 : f32
    %55 = vector.broadcast %cst_13 : f32 to vector<1x2048xf32>
    %56 = arith.subf %55, %54 : vector<1x2048xf32>
    %cst_14 = arith.constant 1.000000e+00 : f32
    %57 = vector.broadcast %cst_14 : f32 to vector<1x2048xf32>
    %58 = arith.addf %57, %54 : vector<1x2048xf32>
    %59 = arith.mulf %56, %58 : vector<1x2048xf32>
    %60 = math.log %59 : vector<1x2048xf32>
    %cst_15 = arith.constant 0.000000e+00 : f32
    %61 = vector.broadcast %cst_15 : f32 to vector<1x2048xf32>
    %62 = arith.subf %61, %60 : vector<1x2048xf32>
    %cst_16 = arith.constant 0.000000e+00 : f32
    %63 = vector.broadcast %cst_16 : f32 to vector<1x2048xf32>
    %64 = arith.maximumf %62, %63 : vector<1x2048xf32>
    %cst_17 = arith.constant 2.500000e+00 : f32
    %65 = vector.broadcast %cst_17 : f32 to vector<1x2048xf32>
    %66 = arith.subf %64, %65 : vector<1x2048xf32>
    %cst_18 = arith.constant 2.81022636E-8 : f32
    %67 = vector.broadcast %cst_18 : f32 to vector<1x2048xf32>
    %68 = arith.mulf %67, %66 : vector<1x2048xf32>
    %cst_19 = arith.constant 3.43273939E-7 : f32
    %69 = vector.broadcast %cst_19 : f32 to vector<1x2048xf32>
    %70 = arith.addf %68, %69 : vector<1x2048xf32>
    %71 = arith.mulf %70, %66 : vector<1x2048xf32>
    %cst_20 = arith.constant -3.5233877E-6 : f32
    %72 = vector.broadcast %cst_20 : f32 to vector<1x2048xf32>
    %73 = arith.addf %71, %72 : vector<1x2048xf32>
    %74 = arith.mulf %73, %66 : vector<1x2048xf32>
    %cst_21 = arith.constant -4.39150654E-6 : f32
    %75 = vector.broadcast %cst_21 : f32 to vector<1x2048xf32>
    %76 = arith.addf %74, %75 : vector<1x2048xf32>
    %77 = arith.mulf %76, %66 : vector<1x2048xf32>
    %cst_22 = arith.constant 2.1858087E-4 : f32
    %78 = vector.broadcast %cst_22 : f32 to vector<1x2048xf32>
    %79 = arith.addf %77, %78 : vector<1x2048xf32>
    %80 = arith.mulf %79, %66 : vector<1x2048xf32>
    %cst_23 = arith.constant -0.00125372503 : f32
    %81 = vector.broadcast %cst_23 : f32 to vector<1x2048xf32>
    %82 = arith.addf %80, %81 : vector<1x2048xf32>
    %83 = arith.mulf %82, %66 : vector<1x2048xf32>
    %cst_24 = arith.constant -0.00417768164 : f32
    %84 = vector.broadcast %cst_24 : f32 to vector<1x2048xf32>
    %85 = arith.addf %83, %84 : vector<1x2048xf32>
    %86 = arith.mulf %85, %66 : vector<1x2048xf32>
    %cst_25 = arith.constant 0.246640727 : f32
    %87 = vector.broadcast %cst_25 : f32 to vector<1x2048xf32>
    %88 = arith.addf %86, %87 : vector<1x2048xf32>
    %89 = arith.mulf %88, %66 : vector<1x2048xf32>
    %cst_26 = arith.constant 1.50140941 : f32
    %90 = vector.broadcast %cst_26 : f32 to vector<1x2048xf32>
    %91 = arith.addf %89, %90 : vector<1x2048xf32>
    %92 = math.sqrt %64 : vector<1x2048xf32>
    %cst_27 = arith.constant 3.000000e+00 : f32
    %93 = vector.broadcast %cst_27 : f32 to vector<1x2048xf32>
    %94 = arith.subf %92, %93 : vector<1x2048xf32>
    %cst_28 = arith.constant -2.00214257E-4 : f32
    %95 = vector.broadcast %cst_28 : f32 to vector<1x2048xf32>
    %96 = arith.mulf %95, %94 : vector<1x2048xf32>
    %cst_29 = arith.constant 1.00950558E-4 : f32
    %97 = vector.broadcast %cst_29 : f32 to vector<1x2048xf32>
    %98 = arith.addf %96, %97 : vector<1x2048xf32>
    %99 = arith.mulf %98, %94 : vector<1x2048xf32>
    %cst_30 = arith.constant 0.00134934322 : f32
    %100 = vector.broadcast %cst_30 : f32 to vector<1x2048xf32>
    %101 = arith.addf %99, %100 : vector<1x2048xf32>
    %102 = arith.mulf %101, %94 : vector<1x2048xf32>
    %cst_31 = arith.constant -0.00367342844 : f32
    %103 = vector.broadcast %cst_31 : f32 to vector<1x2048xf32>
    %104 = arith.addf %102, %103 : vector<1x2048xf32>
    %105 = arith.mulf %104, %94 : vector<1x2048xf32>
    %cst_32 = arith.constant 0.00573950773 : f32
    %106 = vector.broadcast %cst_32 : f32 to vector<1x2048xf32>
    %107 = arith.addf %105, %106 : vector<1x2048xf32>
    %108 = arith.mulf %107, %94 : vector<1x2048xf32>
    %cst_33 = arith.constant -0.0076224613 : f32
    %109 = vector.broadcast %cst_33 : f32 to vector<1x2048xf32>
    %110 = arith.addf %108, %109 : vector<1x2048xf32>
    %111 = arith.mulf %110, %94 : vector<1x2048xf32>
    %cst_34 = arith.constant 0.00943887047 : f32
    %112 = vector.broadcast %cst_34 : f32 to vector<1x2048xf32>
    %113 = arith.addf %111, %112 : vector<1x2048xf32>
    %114 = arith.mulf %113, %94 : vector<1x2048xf32>
    %cst_35 = arith.constant 1.00167406 : f32
    %115 = vector.broadcast %cst_35 : f32 to vector<1x2048xf32>
    %116 = arith.addf %114, %115 : vector<1x2048xf32>
    %117 = arith.mulf %116, %94 : vector<1x2048xf32>
    %cst_36 = arith.constant 2.83297682 : f32
    %118 = vector.broadcast %cst_36 : f32 to vector<1x2048xf32>
    %119 = arith.addf %117, %118 : vector<1x2048xf32>
    %cst_37 = arith.constant 5.000000e+00 : f32
    %120 = vector.broadcast %cst_37 : f32 to vector<1x2048xf32>
    %121 = arith.cmpf olt, %64, %120 : vector<1x2048xf32>
    %122 = arith.select %121, %91, %119 : vector<1x2048xi1>, vector<1x2048xf32>
    %cst_38 = arith.constant 1.41421354 : f32
    %123 = vector.broadcast %cst_38 : f32 to vector<1x2048xf32>
    %124 = arith.mulf %123, %122 : vector<1x2048xf32>
    %125 = arith.mulf %124, %54 : vector<1x2048xf32>
    %cst_39 = arith.constant 1.34985876 : f32
    %126 = vector.broadcast %cst_39 : f32 to vector<1x2048xf32>
    %127 = arith.mulf %125, %126 : vector<1x2048xf32>
    %cst_40 = arith.constant 1.000000e+00 : f32
    %128 = vector.broadcast %cst_40 : f32 to vector<1x2048xf32>
    %129 = arith.addf %127, %128 : vector<1x2048xf32>
    %c0_41 = arith.constant 0 : index
    %c0_42 = arith.constant 0 : index
    %130 = vector.load %arg2[%c0_41, %c0_42] : memref<1x2048xf32, #tpu.memory_space<vmem>>, vector<1x2048xf32>
    %131 = arith.mulf %130, %129 : vector<1x2048xf32>
    %c0_43 = arith.constant 0 : index
    %c0_44 = arith.constant 0 : index
    %132 = vector.load %arg3[%c0_43, %c0_44] : memref<1x2048xf32, #tpu.memory_space<vmem>>, vector<1x2048xf32>
    tpu.vector_store %arg3[%c0_43, %c0_44], %131 {strides = array<i32>} : memref<1x2048xf32, #tpu.memory_space<vmem>>, vector<1x2048xf32>,
    return
  }
  func.func @transform_0(%arg0: i32, %arg1: memref<1xi32, #tpu.memory_space<smem>>) -> (i32, i32) {
    %c0_i32 = arith.constant 0 : i32
    %c0_i32_0 = arith.constant 0 : i32
    return %arg0, %c0_i32 : i32, i32
  }
  func.func @transform_1(%arg0: i32, %arg1: memref<1xi32, #tpu.memory_space<smem>>) -> (i32, i32) {
    %c0_i32 = arith.constant 0 : i32
    %c0_i32_0 = arith.constant 0 : i32
    return %arg0, %c0_i32 : i32, i32
  }
}

</mosaic_0001>

<bundles_post_ra>
// kernel: tpu_custom_call.1
= control target key start
LH: loop header
LB: loop body
LE: loop exit
PB: predicated region body
PF: predicated region fallthrough
CT: control target
= control target key end

     0   :  { %8 = vsyncpa [#allocation5], 0  ;;  %s2345_s0 = inlined_call_operand.<no memory space> [shape: s32[1], index: 0, kind: input, shape index: {}]   ;;  %s2346_s1 = inlined_call_operand.hbm [shape: f32[1,2048], index: 1, kind: input, shape index: {}]   ;;  %s2347_s2 = inlined_call_operand.hbm [shape: f32[1,2048], index: 2, kind: output, shape index: {}]  }
   0x1   :  { %9 = vsyncpa [#allocation6], 0  ;;  %s1603_s9 = smov [#allocation4]  }
   0x2   :  { %s16_s10 = sshll.u32 %s1603_s9, 4  ;;  %s17_s10 = int_to_ptr.vmem [resolvable:$true] %s16_s10 }
   0x3   :  { %s1567_s11 = scalar_lea.vmem %s17_s10, 256  ;;  %p1572_p1 = scmp.lt.s32.totalorder %s17_s10, %s17_s10 }
   0x4   :  { %p1568_p0 = scmp.ne.s32.totalorder %s17_s10, %s1567_s11  ;;  %p1573_p2 = scmp.lt.s32.totalorder %s1567_s11, %s1567_s11 }
   0x6   :  { %p1574_p3 = por %p1573_p2, %p1572_p1 }
   0x8   :  { %p1575_p4 = pnand %p1574_p3, %p1568_p0 }
   0xa   :  { %1578 = shalt.err (!%p1575_p4)
}
   0xb   :  { %19 = dma.hbm_to_vmem [thread:$0]  %s2346_s1, 256, %s17_s10, [#allocation5]  }
   0xc   :  { %1599 = dma.done.wait [#allocation5], 256  }
   0xd   :  { %1600 = vsyncadd [#allocation5], 4294967040  ;;  %s62_s16 = sxor.u32 2654435769, %s2345_s0  ;;  %v23_v0 = vlaneseq  ;;  %s1605_s26 = smov [#allocation7]  }
   0xe   :  { %s63_s17 = sshra.s32 %s62_s16, 16  ;;  %s1371_s27 = sshll.u32 %s1605_s26, 4  ;;  %s1372_s27 = int_to_ptr.vmem [resolvable:$true] %s1371_s27 }
   0xf   :  { %s64_s18 = sand.u32 65535, %s63_s17  ;;  %v1627_v1 = vshrl.u32 %v23_v0, 7  ;;  %v28_v2 = vand.u32 127, %v23_v0  ;;  %s1579_s28 = scalar_lea.vmem %s1372_s27, 256 }
  0x10   :  { %s65_s19 = sxor.u32 %s64_s18, %s62_s16  ;;  %p1580_p5 = scmp.ne.s32.totalorder %s1372_s27, %s1579_s28 }
  0x11   :  { %s66_s20 = smul.u32 2146121005, %s65_s19  ;;  %2377 = vst [vmem:[#allocation10_spill] sm:$0xff] %v1627_v1  ;;  %v29_v3 = vadd.s32 128, %v28_v2  ;;  %v44_v4 = vmul.u32 2048, %v1627_v1  ;;  %v30_v5 = vadd.s32 256, %v28_v2  ;;  %p1584_p6 = scmp.lt.s32.totalorder %s1372_s27, %s1372_s27 }
  0x12   :  { %v31_v6 = vadd.s32 384, %v28_v2  ;;  %v32_v7 = vadd.s32 512, %v28_v2  ;;  %v33_v8 = vadd.s32 640, %v28_v2  ;;  %v34_v9 = vadd.s32 768, %v28_v2  ;;  %p1585_p7 = scmp.lt.s32.totalorder %s1579_s28, %s1579_s28 }
  0x13   :  { %s67_s21 = sshra.s32 %s66_s20, 15  ;;  %v35_v10 = vadd.s32 896, %v28_v2  ;;  %v36_v11 = vadd.s32 1024, %v28_v2  ;;  %v37_v12 = vadd.s32 1152, %v28_v2  ;;  %v38_v13 = vadd.s32 1280, %v28_v2 }
  0x14   :  { %s68_s22 = sand.u32 131071, %s67_s21  ;;  %v45_v14 = vadd.s32 %v44_v4, %v28_v2  ;;  %v46_v15 = vadd.s32 %v44_v4, %v29_v3  ;;  %v39_v16 = vadd.s32 1408, %v28_v2  ;;  %v47_v17 = vadd.s32 %v44_v4, %v30_v5  ;;  %p1586_p8 = por %p1585_p7, %p1584_p6 }
  0x15   :  { %s69_s23 = sxor.u32 %s68_s22, %s66_s20  ;;  %v48_v18 = vadd.s32 %v44_v4, %v31_v6  ;;  %v40_v20 = vadd.s32 1536, %v28_v2  ;;  %v41_v21 = vadd.s32 1664, %v28_v2  ;;  %v49_v22 = vadd.s32 %v44_v4, %v32_v7 }
  0x16   :  { %s70_s24 = smul.u32 2221713035, %s69_s23  ;;  %v50_v23 = vadd.s32 %v44_v4, %v33_v8  ;;  %v42_v24 = vadd.s32 1792, %v28_v2  ;;  %v43_v25 = vadd.s32 1920, %v28_v2  ;;  %v51_v26 = vadd.s32 %v44_v4, %v34_v9  ;;  %p1587_p9 = pnand %p1586_p8, %p1580_p5 }
  0x17   :  { %v52_v27 = vadd.s32 %v44_v4, %v35_v10  ;;  %v53_v28 = vadd.s32 %v44_v4, %v36_v11  ;;  %v54_v29 = vadd.s32 %v44_v4, %v37_v12  ;;  %v55_v32 = vadd.s32 %v44_v4, %v38_v13 }
  0x18   :  { %s71_s25 = sshra.s32 %s70_s24, 16  ;;  %v56_v33 = vadd.s32 %v44_v4, %v39_v16  ;;  %v57_v36 = vadd.s32 %v44_v4, %v40_v20  ;;  %v58_v37 = vadd.s32 %v44_v4, %v41_v21  ;;  %v59_v40 = vadd.s32 %v44_v4, %v42_v24 }
  0x19   :  { %s72_s1 = sand.u32 65535, %s71_s25  ;;  %v60_v41 = vadd.s32 %v44_v4, %v43_v25 }
  0x1a   :  { %s73_s0 = sxor.u32 %s72_s1, %s70_s24 }
  0x1b   :  { %v74_v19 = vstv %s73_s0 }
  0x1c   :  { %v75_v30 = vxor.u32 %v74_v19, %v45_v14  ;;  %v76_v31 = vxor.u32 %v74_v19, %v46_v15  ;;  %v77_v34 = vxor.u32 %v74_v19, %v47_v17  ;;  %v78_v35 = vxor.u32 %v74_v19, %v48_v18 }
  0x1d   :  { %v79_v38 = vxor.u32 %v74_v19, %v49_v22  ;;  %v80_v39 = vxor.u32 %v74_v19, %v50_v23  ;;  %v81_v42 = vxor.u32 %v74_v19, %v51_v26  ;;  %v82_v43 = vxor.u32 %v74_v19, %v52_v27 }
  0x1e   :  { %v83_v44 = vxor.u32 %v74_v19, %v53_v28  ;;  %v84_v45 = vxor.u32 %v74_v19, %v54_v29  ;;  %v1380_v46 = vshrl.u32 %v75_v30, 16  ;;  %v1381_v47 = vshrl.u32 %v76_v31, 16 }
  0x1f   :  { %v85_v48 = vxor.u32 %v74_v19, %v55_v32  ;;  %v86_v49 = vxor.u32 %v74_v19, %v56_v33  ;;  %v1382_v50 = vshrl.u32 %v77_v34, 16  ;;  %v1383_v51 = vshrl.u32 %v78_v35, 16 }
  0x20   :  { %v87_v52 = vxor.u32 %v74_v19, %v57_v36  ;;  %v88_v53 = vxor.u32 %v74_v19, %v58_v37  ;;  %v1384_v54 = vshrl.u32 %v79_v38, 16  ;;  %v1385_v55 = vshrl.u32 %v80_v39, 16 }
  0x21   :  { %v89_v56 = vxor.u32 %v74_v19, %v59_v40  ;;  %v90_v57 = vxor.u32 %v74_v19, %v60_v41  ;;  %v1386_v58 = vshrl.u32 %v81_v42, 16  ;;  %v1387_v59 = vshrl.u32 %v82_v43, 16 }
  0x22   :  { %v1388_v60 = vshrl.u32 %v83_v44, 16  ;;  %v1389_v61 = vshrl.u32 %v84_v45, 16  ;;  %v123_v62 = vxor.u32 %v1380_v46, %v75_v30  ;;  %v124_v63 = vxor.u32 %v1381_v47, %v76_v31 }
  0x23   :  { %v1390_v0 = vshrl.u32 %v85_v48, 16  ;;  %v1391_v2 = vshrl.u32 %v86_v49, 16  ;;  %v125_v3 = vxor.u32 %v1382_v50, %v77_v34  ;;  %v126_v4 = vxor.u32 %v1383_v51, %v78_v35 }
  0x24   :  { %v1392_v5 = vshrl.u32 %v87_v52, 16  ;;  %v1393_v6 = vshrl.u32 %v88_v53, 16  ;;  %v127_v7 = vxor.u32 %v1384_v54, %v79_v38  ;;  %v128_v8 = vxor.u32 %v1385_v55, %v80_v39 }
  0x25   :  { %v1394_v9 = vshrl.u32 %v89_v56, 16  ;;  %v1395_v10 = vshrl.u32 %v90_v57, 16  ;;  %v129_v11 = vxor.u32 %v1386_v58, %v81_v42  ;;  %v130_v12 = vxor.u32 %v1387_v59, %v82_v43 }
  0x26   :  { %v131_v13 = vxor.u32 %v1388_v60, %v83_v44  ;;  %v132_v14 = vxor.u32 %v1389_v61, %v84_v45  ;;  %v139_v15 = vmul.u32 2146121005, %v123_v62  ;;  %v140_v16 = vmul.u32 2146121005, %v124_v63 }
  0x27   :  { %v133_v17 = vxor.u32 %v1390_v0, %v85_v48  ;;  %v134_v18 = vxor.u32 %v1391_v2, %v86_v49  ;;  %v141_v19 = vmul.u32 2146121005, %v125_v3  ;;  %v142_v20 = vmul.u32 2146121005, %v126_v4 }
  0x28   :  { %v135_v21 = vxor.u32 %v1392_v5, %v87_v52  ;;  %v136_v22 = vxor.u32 %v1393_v6, %v88_v53  ;;  %v143_v23 = vmul.u32 2146121005, %v127_v7  ;;  %v144_v24 = vmul.u32 2146121005, %v128_v8 }
  0x29   :  { %v137_v25 = vxor.u32 %v1394_v9, %v89_v56  ;;  %v138_v26 = vxor.u32 %v1395_v10, %v90_v57  ;;  %v145_v27 = vmul.u32 2146121005, %v129_v11  ;;  %v146_v28 = vmul.u32 2146121005, %v130_v12 }
  0x2a   :  { %v147_v29 = vmul.u32 2146121005, %v131_v13  ;;  %v148_v30 = vmul.u32 2146121005, %v132_v14  ;;  %v1396_v31 = vshrl.u32 %v139_v15, 15  ;;  %v1397_v32 = vshrl.u32 %v140_v16, 15 }
  0x2b   :  { %v149_v33 = vmul.u32 2146121005, %v133_v17  ;;  %v150_v34 = vmul.u32 2146121005, %v134_v18  ;;  %v1398_v35 = vshrl.u32 %v141_v19, 15  ;;  %v1399_v36 = vshrl.u32 %v142_v20, 15 }
  0x2c   :  { %v151_v37 = vmul.u32 2146121005, %v135_v21  ;;  %v152_v38 = vmul.u32 2146121005, %v136_v22  ;;  %v1400_v39 = vshrl.u32 %v143_v23, 15  ;;  %v1401_v40 = vshrl.u32 %v144_v24, 15 }
  0x2d   :  { %v153_v41 = vmul.u32 2146121005, %v137_v25  ;;  %v154_v42 = vmul.u32 2146121005, %v138_v26  ;;  %v1402_v43 = vshrl.u32 %v145_v27, 15  ;;  %v1403_v44 = vshrl.u32 %v146_v28, 15 }
  0x2e   :  { %v1404_v45 = vshrl.u32 %v147_v29, 15  ;;  %v1405_v46 = vshrl.u32 %v148_v30, 15  ;;  %v187_v47 = vxor.u32 %v1396_v31, %v139_v15  ;;  %v188_v48 = vxor.u32 %v1397_v32, %v140_v16 }
  0x2f   :  { %v1406_v49 = vshrl.u32 %v149_v33, 15  ;;  %v1407_v50 = vshrl.u32 %v150_v34, 15  ;;  %v189_v51 = vxor.u32 %v1398_v35, %v141_v19  ;;  %v190_v52 = vxor.u32 %v1399_v36, %v142_v20 }
  0x30   :  { %v1408_v53 = vshrl.u32 %v151_v37, 15  ;;  %v1409_v54 = vshrl.u32 %v152_v38, 15  ;;  %v191_v55 = vxor.u32 %v1400_v39, %v143_v23  ;;  %v192_v56 = vxor.u32 %v1401_v40, %v144_v24 }
  0x31   :  { %v1410_v57 = vshrl.u32 %v153_v41, 15  ;;  %v1411_v58 = vshrl.u32 %v154_v42, 15  ;;  %v193_v59 = vxor.u32 %v1402_v43, %v145_v27  ;;  %v194_v60 = vxor.u32 %v1403_v44, %v146_v28 }
  0x32   :  { %v195_v61 = vxor.u32 %v1404_v45, %v147_v29  ;;  %v196_v62 = vxor.u32 %v1405_v46, %v148_v30  ;;  %v203_v63 = vmul.u32 2221713035, %v187_v47  ;;  %v204_v0 = vmul.u32 2221713035, %v188_v48 }
  0x33   :  { %v197_v2 = vxor.u32 %v1406_v49, %v149_v33  ;;  %v198_v3 = vxor.u32 %v1407_v50, %v150_v34  ;;  %v205_v4 = vmul.u32 2221713035, %v189_v51  ;;  %v206_v5 = vmul.u32 2221713035, %v190_v52 }
  0x34   :  { %v199_v6 = vxor.u32 %v1408_v53, %v151_v37  ;;  %v200_v7 = vxor.u32 %v1409_v54, %v152_v38  ;;  %v207_v8 = vmul.u32 2221713035, %v191_v55  ;;  %v208_v9 = vmul.u32 2221713035, %v192_v56 }
  0x35   :  { %v201_v10 = vxor.u32 %v1410_v57, %v153_v41  ;;  %v202_v11 = vxor.u32 %v1411_v58, %v154_v42  ;;  %v209_v12 = vmul.u32 2221713035, %v193_v59  ;;  %v210_v13 = vmul.u32 2221713035, %v194_v60 }
  0x36   :  { %v211_v14 = vmul.u32 2221713035, %v195_v61  ;;  %v212_v15 = vmul.u32 2221713035, %v196_v62  ;;  %v1412_v16 = vshrl.u32 %v203_v63, 16  ;;  %v1413_v19 = vshrl.u32 %v204_v0, 16 }
  0x37   :  { %v213_v17 = vmul.u32 2221713035, %v197_v2  ;;  %v214_v18 = vmul.u32 2221713035, %v198_v3  ;;  %v1414_v22 = vshrl.u32 %v205_v4, 16  ;;  %v1415_v25 = vshrl.u32 %v206_v5, 16 }
  0x38   :  { %v215_v20 = vmul.u32 2221713035, %v199_v6  ;;  %v216_v21 = vmul.u32 2221713035, %v200_v7  ;;  %v1416_v26 = vshrl.u32 %v207_v8, 16  ;;  %v1417_v27 = vshrl.u32 %v208_v9, 16 }
  0x39   :  { %v217_v23 = vmul.u32 2221713035, %v201_v10  ;;  %v218_v24 = vmul.u32 2221713035, %v202_v11  ;;  %v1418_v28 = vshrl.u32 %v209_v12, 16  ;;  %v251_v29 = vxor.u32 %v1412_v16, %v203_v63 }
  0x3a   :  { %v1419_v30 = vshrl.u32 %v210_v13, 16  ;;  %v1420_v31 = vshrl.u32 %v211_v14, 16  ;;  %v1421_v32 = vshrl.u32 %v212_v15, 16  ;;  %v252_v33 = vxor.u32 %v1413_v19, %v204_v0 }
  0x3b   :  { %v1422_v34 = vshrl.u32 %v213_v17, 16  ;;  %v1423_v35 = vshrl.u32 %v214_v18, 16  ;;  %v1424_v36 = vshrl.u32 %v215_v20, 16  ;;  %v253_v37 = vxor.u32 %v1414_v22, %v205_v4 }
  0x3c   :  { %v1425_v38 = vshrl.u32 %v216_v21, 16  ;;  %v1426_v39 = vshrl.u32 %v217_v23, 16  ;;  %v1427_v40 = vshrl.u32 %v218_v24, 16  ;;  %v254_v41 = vxor.u32 %v1415_v25, %v206_v5 }
  0x3d   :  { %v255_v42 = vxor.u32 %v1416_v26, %v207_v8  ;;  %v256_v43 = vxor.u32 %v1417_v27, %v208_v9  ;;  %v257_v44 = vxor.u32 %v1418_v28, %v209_v12  ;;  %v1428_v45 = vshrl.u32 %v251_v29, 8 }
  0x3e   :  { %v258_v46 = vxor.u32 %v1419_v30, %v210_v13  ;;  %v259_v47 = vxor.u32 %v1420_v31, %v211_v14  ;;  %v260_v48 = vxor.u32 %v1421_v32, %v212_v15  ;;  %v1429_v49 = vshrl.u32 %v252_v33, 8 }
  0x3f   :  { %v261_v50 = vxor.u32 %v1422_v34, %v213_v17  ;;  %v262_v51 = vxor.u32 %v1423_v35, %v214_v18  ;;  %v263_v52 = vxor.u32 %v1424_v36, %v215_v20  ;;  %v1430_v53 = vshrl.u32 %v253_v37, 8 }
  0x40   :  { %v264_v54 = vxor.u32 %v1425_v38, %v216_v21  ;;  %v265_v55 = vxor.u32 %v1426_v39, %v217_v23  ;;  %v266_v56 = vxor.u32 %v1427_v40, %v218_v24  ;;  %v1431_v57 = vshrl.u32 %v254_v41, 8 }
  0x41   :  { %v1432_v58 = vshrl.u32 %v255_v42, 8  ;;  %v1433_v59 = vshrl.u32 %v256_v43, 8  ;;  %v1434_v60 = vshrl.u32 %v257_v44, 8  ;;  %v299_v61 = vcvt.s32.f32 %v1428_v45 }
  0x42   :  { %v1435_v62 = vshrl.u32 %v258_v46, 8  ;;  %v1436_v63 = vshrl.u32 %v259_v47, 8  ;;  %v1437_v0 = vshrl.u32 %v260_v48, 8  ;;  %v300_v2 = vcvt.s32.f32 %v1429_v49 }
  0x43   :  { %v1438_v3 = vshrl.u32 %v261_v50, 8  ;;  %v1439_v4 = vshrl.u32 %v262_v51, 8  ;;  %v1440_v5 = vshrl.u32 %v263_v52, 8  ;;  %v301_v6 = vcvt.s32.f32 %v1430_v53 }
  0x44   :  { %v1441_v7 = vshrl.u32 %v264_v54, 8  ;;  %v1442_v8 = vshrl.u32 %v265_v55, 8  ;;  %v1443_v9 = vshrl.u32 %v266_v56, 8  ;;  %v302_v10 = vcvt.s32.f32 %v1431_v57 }
  0x45   :  { %v303_v11 = vcvt.s32.f32 %v1432_v58  ;;  %v304_v12 = vcvt.s32.f32 %v1433_v59  ;;  %v305_v13 = vcvt.s32.f32 %v1434_v60  ;;  %v315_v14 = vadd.f32 0.5, %v299_v61 }
  0x46   :  { %v306_v15 = vcvt.s32.f32 %v1435_v62  ;;  %v307_v16 = vcvt.s32.f32 %v1436_v63  ;;  %v308_v17 = vcvt.s32.f32 %v1437_v0  ;;  %v316_v18 = vadd.f32 0.5, %v300_v2 }
  0x47   :  { %v309_v19 = vcvt.s32.f32 %v1438_v3  ;;  %v310_v20 = vcvt.s32.f32 %v1439_v4  ;;  %v311_v21 = vcvt.s32.f32 %v1440_v5  ;;  %v317_v22 = vadd.f32 0.5, %v301_v6 }
  0x48   :  { %v312_v23 = vcvt.s32.f32 %v1441_v7  ;;  %v313_v24 = vcvt.s32.f32 %v1442_v8  ;;  %v314_v25 = vcvt.s32.f32 %v1443_v9  ;;  %v318_v26 = vadd.f32 0.5, %v302_v10 }
  0x49   :  { %v319_v27 = vadd.f32 0.5, %v303_v11  ;;  %v320_v28 = vadd.f32 0.5, %v304_v12  ;;  %v321_v29 = vadd.f32 0.5, %v305_v13  ;;  %v331_v30 = vmul.f32 5.9604645e-08, %v315_v14 }
  0x4a   :  { %v322_v31 = vadd.f32 0.5, %v306_v15  ;;  %v323_v32 = vadd.f32 0.5, %v307_v16  ;;  %v324_v33 = vadd.f32 0.5, %v308_v17  ;;  %v332_v34 = vmul.f32 5.9604645e-08, %v316_v18 }
  0x4b   :  { %v325_v35 = vadd.f32 0.5, %v309_v19  ;;  %v326_v36 = vadd.f32 0.5, %v310_v20  ;;  %v327_v37 = vadd.f32 0.5, %v311_v21  ;;  %v333_v38 = vmul.f32 5.9604645e-08, %v317_v22 }
  0x4c   :  { %v328_v39 = vadd.f32 0.5, %v312_v23  ;;  %v329_v40 = vadd.f32 0.5, %v313_v24  ;;  %v330_v41 = vadd.f32 0.5, %v314_v25  ;;  %v334_v42 = vmul.f32 5.9604645e-08, %v318_v26 }
  0x4d   :  { %v335_v43 = vmul.f32 5.9604645e-08, %v319_v27  ;;  %v336_v44 = vmul.f32 5.9604645e-08, %v320_v28  ;;  %v337_v45 = vmul.f32 5.9604645e-08, %v321_v29  ;;  %v347_v46 = vmul.f32 2.0, %v331_v30 }
  0x4e   :  { %v338_v47 = vmul.f32 5.9604645e-08, %v322_v31  ;;  %v339_v48 = vmul.f32 5.9604645e-08, %v323_v32  ;;  %v340_v49 = vmul.f32 5.9604645e-08, %v324_v33  ;;  %v348_v50 = vmul.f32 2.0, %v332_v34 }
  0x4f   :  { %v341_v51 = vmul.f32 5.9604645e-08, %v325_v35  ;;  %v342_v52 = vmul.f32 5.9604645e-08, %v326_v36  ;;  %v343_v53 = vmul.f32 5.9604645e-08, %v327_v37  ;;  %v349_v54 = vmul.f32 2.0, %v333_v38 }
  0x50   :  { %v344_v55 = vmul.f32 5.9604645e-08, %v328_v39  ;;  %v345_v56 = vmul.f32 5.9604645e-08, %v329_v40  ;;  %v346_v57 = vmul.f32 5.9604645e-08, %v330_v41  ;;  %v350_v58 = vmul.f32 2.0, %v334_v42 }
  0x51   :  { %v351_v59 = vmul.f32 2.0, %v335_v43  ;;  %v352_v60 = vmul.f32 2.0, %v336_v44  ;;  %v353_v61 = vmul.f32 2.0, %v337_v45  ;;  %v1630_v62 = vadd.f32 -1.0, %v347_v46 }
  0x52   :  { %v354_v63 = vmul.f32 2.0, %v338_v47  ;;  %v355_v0 = vmul.f32 2.0, %v339_v48  ;;  %v356_v2 = vmul.f32 2.0, %v340_v49  ;;  %v1632_v3 = vadd.f32 -1.0, %v348_v50 }
  0x53   :  { %2378 = vst [vmem:[#allocation11_spill] sm:$0xff] %v1630_v62  ;;  %v357_v4 = vmul.f32 2.0, %v341_v51  ;;  %v358_v5 = vmul.f32 2.0, %v342_v52  ;;  %v359_v6 = vmul.f32 2.0, %v343_v53  ;;  %v1634_v7 = vadd.f32 -1.0, %v349_v54 }
  0x54   :  { %2379 = vst [vmem:[#allocation12_spill] sm:$0xff] %v1632_v3  ;;  %v360_v8 = vmul.f32 2.0, %v344_v55  ;;  %v361_v9 = vmul.f32 2.0, %v345_v56  ;;  %v362_v10 = vmul.f32 2.0, %v346_v57  ;;  %v1636_v11 = vadd.f32 -1.0, %v350_v58 }
  0x55   :  { %2380 = vst [vmem:[#allocation13_spill] sm:$0xff] %v1634_v7  ;;  %v1638_v12 = vadd.f32 -1.0, %v351_v59  ;;  %v1640_v13 = vadd.f32 -1.0, %v352_v60  ;;  %v379_v14 = vsub.f32 1.0, %v1630_v62  ;;  %v395_v15 = vadd.f32 1.0, %v1630_v62 }
  0x56   :  { %2381 = vst [vmem:[#allocation14_spill] sm:$0xff] %v1636_v11  ;;  %v1644_v16 = vadd.f32 -1.0, %v353_v61  ;;  %v1646_v17 = vadd.f32 -1.0, %v354_v63  ;;  %v380_v18 = vsub.f32 1.0, %v1632_v3  ;;  %v396_v19 = vadd.f32 1.0, %v1632_v3 }
  0x57   :  { %2382 = vst [vmem:[#allocation15_spill] sm:$0xff] %v1638_v12  ;;  %2383 = vst [vmem:[#allocation16_spill] sm:$0xff] %v1640_v13  ;;  %v1650_v20 = vadd.f32 -1.0, %v355_v0  ;;  %v1652_v21 = vadd.f32 -1.0, %v356_v2  ;;  %v381_v22 = vsub.f32 1.0, %v1634_v7  ;;  %v397_v23 = vadd.f32 1.0, %v1634_v7 }
  0x58   :  { %2384 = vst [vmem:[#allocation17_spill] sm:$0xff] %v1644_v16  ;;  %2385 = vst [vmem:[#allocation18_spill] sm:$0xff] %v1646_v17  ;;  %v1656_v24 = vadd.f32 -1.0, %v357_v4  ;;  %v1658_v25 = vadd.f32 -1.0, %v358_v5  ;;  %v382_v26 = vsub.f32 1.0, %v1636_v11  ;;  %v398_v27 = vadd.f32 1.0, %v1636_v11 }
  0x59   :  { %2386 = vst [vmem:[#allocation19_spill] sm:$0xff] %v1650_v20  ;;  %2387 = vst [vmem:[#allocation20_spill] sm:$0xff] %v1652_v21  ;;  %v1662_v28 = vadd.f32 -1.0, %v359_v6  ;;  %v383_v29 = vsub.f32 1.0, %v1638_v12  ;;  %v399_v30 = vadd.f32 1.0, %v1638_v12  ;;  %v411_v31 = vmul.f32 %v395_v15, %v379_v14 }
  0x5a   :  { %2388 = vst [vmem:[#allocation21_spill] sm:$0xff] %v1656_v24  ;;  %2389 = vst [vmem:[#allocation22_spill] sm:$0xff] %v1658_v25  ;;  %v1666_v32 = vadd.f32 -1.0, %v360_v8  ;;  %v384_v33 = vsub.f32 1.0, %v1640_v13  ;;  %v400_v34 = vadd.f32 1.0, %v1640_v13  ;;  %v412_v35 = vmul.f32 %v396_v19, %v380_v18 }
  0x5b   :  { %2390 = vst [vmem:[#allocation23_spill] sm:$0xff] %v1662_v28  ;;  %v1670_v36 = vadd.f32 -1.0, %v361_v9  ;;  %v385_v37 = vsub.f32 1.0, %v1644_v16  ;;  %v401_v38 = vadd.f32 1.0, %v1644_v16  ;;  %v413_v39 = vmul.f32 %v397_v23, %v381_v22 }
  0x5c   :  { %2391 = vst [vmem:[#allocation24_spill] sm:$0xff] %v1666_v32  ;;  %v1674_v40 = vadd.f32 -1.0, %v362_v10  ;;  %v386_v41 = vsub.f32 1.0, %v1646_v17  ;;  %v402_v42 = vadd.f32 1.0, %v1646_v17  ;;  %v414_v43 = vmul.f32 %v398_v27, %v382_v26 }
  0x5d   :  { %2392 = vst [vmem:[#allocation25_spill] sm:$0xff] %v1670_v36  ;;  %v387_v44 = vsub.f32 1.0, %v1650_v20  ;;  %v403_v45 = vadd.f32 1.0, %v1650_v20  ;;  %v415_v46 = vmul.f32 %v399_v30, %v383_v29  ;;  %1495 = vlog2.f32 %v411_v31 }
  0x5e   :  { %2393 = vst [vmem:[#allocation26_spill] sm:$0xff] %v1674_v40  ;;  %v388_v47 = vsub.f32 1.0, %v1652_v21  ;;  %v404_v48 = vadd.f32 1.0, %v1652_v21  ;;  %v416_v49 = vmul.f32 %v400_v34, %v384_v33  ;;  %1497 = vlog2.f32 %v412_v35 }
  0x5f   :  { %v389_v50 = vsub.f32 1.0, %v1656_v24  ;;  %v405_v51 = vadd.f32 1.0, %v1656_v24  ;;  %v417_v52 = vmul.f32 %v401_v38, %v385_v37  ;;  %1499 = vlog2.f32 %v413_v39 }
  0x60   :  { %v390_v53 = vsub.f32 1.0, %v1658_v25  ;;  %v406_v54 = vadd.f32 1.0, %v1658_v25  ;;  %v418_v55 = vmul.f32 %v402_v42, %v386_v41  ;;  %1501 = vlog2.f32 %v414_v43 }
  0x61   :  { %v391_v56 = vsub.f32 1.0, %v1662_v28  ;;  %v407_v57 = vadd.f32 1.0, %v1662_v28  ;;  %v419_v58 = vmul.f32 %v403_v45, %v387_v44  ;;  %1503 = vlog2.f32 %v415_v46 }
  0x62   :  { %v392_v59 = vsub.f32 1.0, %v1666_v32  ;;  %v408_v60 = vadd.f32 1.0, %v1666_v32  ;;  %v420_v61 = vmul.f32 %v404_v48, %v388_v47  ;;  %1505 = vlog2.f32 %v416_v49 }
  0x63   :  { %v393_v63 = vsub.f32 1.0, %v1670_v36  ;;  %v409_v0 = vadd.f32 1.0, %v1670_v36  ;;  %v421_v2 = vmul.f32 %v405_v51, %v389_v50  ;;  %1507 = vlog2.f32 %v417_v52 }
  0x64   :  { %v394_v4 = vsub.f32 1.0, %v1674_v40  ;;  %v410_v5 = vadd.f32 1.0, %v1674_v40  ;;  %v422_v6 = vmul.f32 %v406_v54, %v390_v53  ;;  %1509 = vlog2.f32 %v418_v55 }
  0x65   :  { %v423_v8 = vmul.f32 %v407_v57, %v391_v56  ;;  %1511 = vlog2.f32 %v419_v58  ;;  %v424_v9 = vmul.f32 %v408_v60, %v392_v59  ;;  %v425_v10 = vmul.f32 %v409_v0, %v393_v63 }
  0x66   :  { %1513 = vlog2.f32 %v420_v61  ;;  %v426_v14 = vmul.f32 %v410_v5, %v394_v4 }
  0x67   :  { %1515 = vlog2.f32 %v421_v2 }
  0x68   :  { %1517 = vlog2.f32 %v422_v6 }
  0x69   :  { %1519 = vlog2.f32 %v423_v8 }
  0x6a   :  { %v1496_v15 = vpop.eup %1495  ;;  %1521 = vlog2.f32 %v424_v9 }
  0x6b   :  { %v1498_v18 = vpop.eup %1497  ;;  %1523 = vlog2.f32 %v425_v10  ;;  %v428_v22 = vmul.f32 0.6931472, %v1496_v15 }
  0x6c   :  { %v1500_v19 = vpop.eup %1499  ;;  %1525 = vlog2.f32 %v426_v14  ;;  %v430_v26 = vmul.f32 0.6931472, %v1498_v18 }
  0x6d   :  { %v1502_v23 = vpop.eup %1501  ;;  %v432_v27 = vmul.f32 0.6931472, %v1500_v19  ;;  %v459_v35 = vsub.f32 0.0, %v428_v22 }
  0x6e   :  { %v1504_v29 = vpop.eup %1503  ;;  %v434_v30 = vmul.f32 0.6931472, %v1502_v23  ;;  %v460_v39 = vsub.f32 0.0, %v430_v26 }
  0x6f   :  { %v1506_v31 = vpop.eup %1505  ;;  %v436_v34 = vmul.f32 0.6931472, %v1504_v29  ;;  %v461_v41 = vsub.f32 0.0, %v432_v27  ;;  %v1694_v51 = vmax.f32 %v459_v35, 0.0 }
  0x70   :  { %v1508_v33 = vpop.eup %1507  ;;  %v438_v38 = vmul.f32 0.6931472, %v1506_v31  ;;  %v462_v44 = vsub.f32 0.0, %v434_v30  ;;  %v1696_v55 = vmax.f32 %v460_v39, 0.0 }
  0x71   :  { %v1510_v37 = vpop.eup %1509  ;;  %v440_v43 = vmul.f32 0.6931472, %v1508_v33  ;;  %v463_v50 = vsub.f32 0.0, %v436_v34  ;;  %v1698_v56 = vmax.f32 %v461_v41, 0.0  ;;  %v1703_v61 = vadd.f32 -2.5, %v1694_v51 }
  0x72   :  { %v1512_v42 = vpop.eup %1511  ;;  %v442_v46 = vmul.f32 0.6931472, %v1510_v37  ;;  %v464_v54 = vsub.f32 0.0, %v438_v38  ;;  %v1700_v60 = vmax.f32 %v462_v44, 0.0  ;;  %v1706_v5 = vadd.f32 -2.5, %v1696_v55 }
  0x73   :  { %v1514_v45 = vpop.eup %1513  ;;  %v444_v47 = vmul.f32 0.6931472, %v1512_v42  ;;  %v465_v59 = vsub.f32 0.0, %v440_v43  ;;  %v1708_v14 = vmax.f32 %v463_v50, 0.0  ;;  %v1713_v22 = vadd.f32 -2.5, %v1698_v56 }
  0x74   :  { %v1516_v48 = vpop.eup %1515  ;;  %v446_v49 = vmul.f32 0.6931472, %v1514_v45  ;;  %v466_v2 = vsub.f32 0.0, %v442_v46  ;;  %v1710_v19 = vmax.f32 %v464_v54, 0.0  ;;  %v1716_v23 = vadd.f32 -2.5, %v1700_v60 }
  0x75   :  { %v1518_v52 = vpop.eup %1517  ;;  %v448_v53 = vmul.f32 0.6931472, %v1516_v48  ;;  %v467_v4 = vsub.f32 0.0, %v444_v47  ;;  %v1718_v30 = vmax.f32 %v465_v59, 0.0  ;;  %v1729_v41 = vadd.f32 -2.5, %v1708_v14 }
  0x76   :  { %v1520_v57 = vpop.eup %1519  ;;  %v450_v58 = vmul.f32 0.6931472, %v1518_v52  ;;  %v468_v9 = vsub.f32 0.0, %v446_v49  ;;  %v1720_v34 = vmax.f32 %v466_v2, 0.0  ;;  %v1732_v42 = vadd.f32 -2.5, %v1710_v19 }
  0x77   :  { %v1522_v63 = vpop.eup %1521  ;;  %v452_v0 = vmul.f32 0.6931472, %v1520_v57  ;;  %v469_v10 = vsub.f32 0.0, %v448_v53  ;;  %v1722_v35 = vmax.f32 %v467_v4, 0.0  ;;  %v1735_v43 = vadd.f32 -2.5, %v1718_v30 }
  0x78   :  { %v1524_v6 = vpop.eup %1523  ;;  %v454_v8 = vmul.f32 0.6931472, %v1522_v63  ;;  %v470_v27 = vsub.f32 0.0, %v450_v58  ;;  %v1724_v38 = vmax.f32 %v468_v9, 0.0  ;;  %v1738_v44 = vadd.f32 -2.5, %v1720_v34 }
  0x79   :  { %v1526_v15 = vpop.eup %1525  ;;  %v456_v18 = vmul.f32 0.6931472, %v1524_v6  ;;  %v471_v29 = vsub.f32 0.0, %v452_v0  ;;  %v1726_v39 = vmax.f32 %v469_v10, 0.0  ;;  %v1741_v45 = vadd.f32 -2.5, %v1722_v35 }
  0x7a   :  { %v458_v26 = vmul.f32 0.6931472, %v1526_v15  ;;  %v472_v31 = vsub.f32 0.0, %v454_v8  ;;  %v1743_v46 = vmax.f32 %v470_v27, 0.0  ;;  %v1748_v48 = vadd.f32 -2.5, %v1724_v38 }
  0x7b   :  { %v473_v33 = vsub.f32 0.0, %v456_v18  ;;  %v1745_v47 = vmax.f32 %v471_v29, 0.0  ;;  %v1751_v49 = vadd.f32 -2.5, %v1726_v39  ;;  %v507_v54 = vmul.f32 2.8102264e-08, %v1703_v61 }
  0x7c   :  { %v474_v37 = vsub.f32 0.0, %v458_v26  ;;  %2394 = vst [vmem:[#allocation27_spill] sm:$0xff] %v1743_v46  ;;  %v1753_v50 = vmax.f32 %v472_v31, 0.0  ;;  %v1761_v57 = vadd.f32 -2.5, %v1743_v46  ;;  %v508_v59 = vmul.f32 2.8102264e-08, %v1706_v5 }
  0x7d   :  { %2395 = vst [vmem:[#allocation28_spill] sm:$0xff] %v1745_v47  ;;  %v1755_v52 = vmax.f32 %v473_v33, 0.0  ;;  %v1764_v58 = vadd.f32 -2.5, %v1745_v47  ;;  %v509_v63 = vmul.f32 2.8102264e-08, %v1713_v22  ;;  %1527 = vrsqrt.f32 %v1694_v51 }
  0x7e   :  { %2396 = vst [vmem:[#allocation29_spill] sm:$0xff] %v1753_v50  ;;  %v1757_v53 = vmax.f32 %v474_v37, 0.0  ;;  %v1769_v0 = vadd.f32 -2.5, %v1753_v50  ;;  %v510_v6 = vmul.f32 2.8102264e-08, %v1716_v23  ;;  %1529 = vrsqrt.f32 %v1696_v55 }
  0x7f   :  { %2397 = vst [vmem:[#allocation30_spill] sm:$0xff] %v1755_v52  ;;  %v1772_v2 = vadd.f32 -2.5, %v1755_v52  ;;  %v511_v8 = vmul.f32 2.8102264e-08, %v1729_v41  ;;  %v512_v9 = vmul.f32 2.8102264e-08, %v1732_v42  ;;  %1531 = vrsqrt.f32 %v1698_v56 }
  0x80   :  { %2398 = vst [vmem:[#allocation31_spill] sm:$0xff] %v1757_v53  ;;  %v1775_v4 = vadd.f32 -2.5, %v1757_v53  ;;  %v513_v10 = vmul.f32 2.8102264e-08, %v1735_v43  ;;  %v514_v15 = vmul.f32 2.8102264e-08, %v1738_v44  ;;  %1533 = vrsqrt.f32 %v1700_v60 }
  0x81   :  { %v515_v18 = vmul.f32 2.8102264e-08, %v1741_v45  ;;  %v516_v26 = vmul.f32 2.8102264e-08, %v1748_v48  ;;  %v517_v27 = vmul.f32 2.8102264e-08, %v1751_v49  ;;  %1535 = vrsqrt.f32 %v1708_v14 }
  0x82   :  { %v518_v29 = vmul.f32 2.8102264e-08, %v1761_v57  ;;  %v519_v31 = vmul.f32 2.8102264e-08, %v1764_v58  ;;  %v520_v33 = vmul.f32 2.8102264e-08, %v1769_v0  ;;  %1537 = vrsqrt.f32 %v1710_v19 }
  0x83   :  { %v521_v37 = vmul.f32 2.8102264e-08, %v1772_v2  ;;  %v522_v1 = vmul.f32 2.8102264e-08, %v1775_v4  ;;  %v523_v40 = vadd.f32 3.4327394e-07, %v507_v54  ;;  %1539 = vrsqrt.f32 %v1718_v30 }
  0x84   :  { %v524_v36 = vadd.f32 3.4327394e-07, %v508_v59  ;;  %v525_v32 = vadd.f32 3.4327394e-07, %v509_v63  ;;  %v526_v28 = vadd.f32 3.4327394e-07, %v510_v6  ;;  %1541 = vrsqrt.f32 %v1720_v34 }
  0x85   :  { %v527_v25 = vadd.f32 3.4327394e-07, %v511_v8  ;;  %v528_v24 = vadd.f32 3.4327394e-07, %v512_v9  ;;  %v529_v21 = vadd.f32 3.4327394e-07, %v513_v10  ;;  %v539_v63 = vmul.f32 %v1703_v61, %v523_v40 }
  0x86   :  { %v530_v20 = vadd.f32 3.4327394e-07, %v514_v15  ;;  %v531_v17 = vadd.f32 3.4327394e-07, %v515_v18  ;;  %v532_v16 = vadd.f32 3.4327394e-07, %v516_v26  ;;  %v540_v6 = vmul.f32 %v1706_v5, %v524_v36 }
  0x87   :  { %v533_v13 = vadd.f32 3.4327394e-07, %v517_v27  ;;  %v534_v12 = vadd.f32 3.4327394e-07, %v518_v29  ;;  %v535_v54 = vadd.f32 3.4327394e-07, %v519_v31  ;;  %v541_v9 = vmul.f32 %v1713_v22, %v525_v32 }
  0x88   :  { %v536_v59 = vadd.f32 3.4327394e-07, %v520_v33  ;;  %v537_v8 = vadd.f32 3.4327394e-07, %v521_v37  ;;  %v542_v10 = vmul.f32 %v1716_v23, %v526_v28  ;;  %v543_v15 = vmul.f32 %v1729_v41, %v527_v25 }
  0x89   :  { %v538_v18 = vadd.f32 3.4327394e-07, %v522_v1  ;;  %v544_v26 = vmul.f32 %v1732_v42, %v528_v24  ;;  %v545_v27 = vmul.f32 %v1735_v43, %v529_v21  ;;  %v546_v29 = vmul.f32 %v1738_v44, %v530_v20 }
  0x8a   :  { %v547_v31 = vmul.f32 %v1741_v45, %v531_v17  ;;  %v548_v40 = vmul.f32 %v1748_v48, %v532_v16  ;;  %v549_v36 = vmul.f32 %v1751_v49, %v533_v13  ;;  %v550_v33 = vmul.f32 %v1761_v57, %v534_v12 }
  0x8b   :  { %v551_v32 = vmul.f32 %v1764_v58, %v535_v54  ;;  %v552_v28 = vmul.f32 %v1769_v0, %v536_v59  ;;  %v555_v25 = vadd.f32 -3.5233877e-06, %v539_v63  ;;  %v556_v1 = vadd.f32 -3.5233877e-06, %v540_v6  ;;  %v1528_v6 = vpop.eup %1527 }
  0x8c   :  { %v553_v24 = vmul.f32 %v1772_v2, %v537_v8  ;;  %v557_v37 = vadd.f32 -3.5233877e-06, %v541_v9  ;;  %v558_v21 = vadd.f32 -3.5233877e-06, %v542_v10  ;;  %v559_v11 = vadd.f32 -3.5233877e-06, %v543_v15 }
  0x8d   :  { %v554_v20 = vmul.f32 %v1775_v4, %v538_v18  ;;  %v560_v17 = vadd.f32 -3.5233877e-06, %v544_v26  ;;  %v561_v7 = vadd.f32 -3.5233877e-06, %v545_v27  ;;  %v562_v16 = vadd.f32 -3.5233877e-06, %v546_v29  ;;  %v1815_v18 = vpop.eup %1529 }
  0x8e   :  { %v563_v3 = vadd.f32 -3.5233877e-06, %v547_v31  ;;  %v564_v13 = vadd.f32 -3.5233877e-06, %v548_v40  ;;  %v565_v62 = vadd.f32 -3.5233877e-06, %v549_v36  ;;  %v571_v63 = vmul.f32 %v1703_v61, %v555_v25  ;;  %v1820_v40 = vpop.eup %1531 }
  0x8f   :  { %v566_v12 = vadd.f32 -3.5233877e-06, %v550_v33  ;;  %v567_v54 = vadd.f32 -3.5233877e-06, %v551_v32  ;;  %v568_v59 = vadd.f32 -3.5233877e-06, %v552_v28  ;;  %v572_v9 = vmul.f32 %v1706_v5, %v556_v1  ;;  %v1826_v25 = vpop.eup %1533 }
  0x90   :  { %v569_v8 = vadd.f32 -3.5233877e-06, %v553_v24  ;;  %v573_v10 = vmul.f32 %v1713_v22, %v557_v37  ;;  %v574_v15 = vmul.f32 %v1716_v23, %v558_v21  ;;  %v570_v26 = vadd.f32 -3.5233877e-06, %v554_v20 }
  0x91   :  { %v575_v27 = vmul.f32 %v1729_v41, %v559_v11  ;;  %v576_v29 = vmul.f32 %v1732_v42, %v560_v17  ;;  %v577_v31 = vmul.f32 %v1735_v43, %v561_v7  ;;  %v578_v36 = vmul.f32 %v1738_v44, %v562_v16 }
  0x92   :  { %v579_v33 = vmul.f32 %v1741_v45, %v563_v3  ;;  %v580_v32 = vmul.f32 %v1748_v48, %v564_v13  ;;  %v581_v28 = vmul.f32 %v1751_v49, %v565_v62  ;;  %v582_v1 = vmul.f32 %v1761_v57, %v566_v12 }
  0x93   :  { %v583_v11 = vmul.f32 %v1764_v58, %v567_v54  ;;  %v584_v24 = vmul.f32 %v1769_v0, %v568_v59  ;;  %v587_v37 = vadd.f32 -4.3915065e-06, %v571_v63  ;;  %vm765_vm0 = vcmp.eq.f32.partialorder %v1694_v51, inf }
  0x94   :  { %v585_v7 = vmul.f32 %v1772_v2, %v569_v8  ;;  %v588_v21 = vadd.f32 -4.3915065e-06, %v572_v9  ;;  %v589_v20 = vadd.f32 -4.3915065e-06, %v573_v10  ;;  %v590_v3 = vadd.f32 -4.3915065e-06, %v574_v15 }
  0x95   :  { %v586_v17 = vmul.f32 %v1775_v4, %v570_v26  ;;  %v591_v16 = vadd.f32 -4.3915065e-06, %v575_v27  ;;  %v592_v62 = vadd.f32 -4.3915065e-06, %v576_v29  ;;  %v593_v13 = vadd.f32 -4.3915065e-06, %v577_v31 }
  0x96   :  { %v594_v53 = vadd.f32 -4.3915065e-06, %v578_v36  ;;  %v595_v52 = vadd.f32 -4.3915065e-06, %v579_v33  ;;  %v596_v12 = vadd.f32 -4.3915065e-06, %v580_v32  ;;  %v764_v50 = vmul.f32 %v1528_v6, %v1694_v51  ;;  %v1845_v32 = vpop.eup %1535 }
  0x97   :  { %v597_v54 = vadd.f32 -4.3915065e-06, %v581_v28  ;;  %v598_v59 = vadd.f32 -4.3915065e-06, %v582_v1  ;;  %v599_v63 = vadd.f32 -4.3915065e-06, %v583_v11  ;;  %v603_v9 = vmul.f32 %v1703_v61, %v587_v37 }
  0x98   :  { %v600_v47 = vadd.f32 -4.3915065e-06, %v584_v24  ;;  %v601_v8 = vadd.f32 -4.3915065e-06, %v585_v7  ;;  %v604_v10 = vmul.f32 %v1706_v5, %v588_v21  ;;  %v602_v15 = vadd.f32 -4.3915065e-06, %v586_v17 }
  0x99   :  { %v605_v26 = vmul.f32 %v1713_v22, %v589_v20  ;;  %v606_v27 = vmul.f32 %v1716_v23, %v590_v3  ;;  %v607_v29 = vmul.f32 %v1729_v41, %v591_v16  ;;  %v608_v31 = vmul.f32 %v1732_v42, %v592_v62 }
  0x9a   :  { %v609_v36 = vmul.f32 %v1735_v43, %v593_v13  ;;  %v610_v33 = vmul.f32 %v1738_v44, %v594_v53  ;;  %v611_v6 = vmul.f32 %v1741_v45, %v595_v52  ;;  %v612_v28 = vmul.f32 %v1748_v48, %v596_v12 }
  0x9b   :  { %v613_v1 = vmul.f32 %v1751_v49, %v597_v54  ;;  %v614_v11 = vmul.f32 %v1761_v57, %v598_v59  ;;  %v615_v24 = vmul.f32 %v1764_v58, %v599_v63  ;;  %v616_v37 = vmul.f32 %v1769_v0, %v600_v47 }
  0x9c   :  { %v617_v7 = vmul.f32 %v1772_v2, %v601_v8  ;;  %v619_v21 = vadd.f32 0.00021858087, %v603_v9  ;;  %v620_v20 = vadd.f32 0.00021858087, %v604_v10  ;;  %v618_v53 = vmul.f32 %v1775_v4, %v602_v15 }
  0x9d   :  { %v621_v3 = vadd.f32 0.00021858087, %v605_v26  ;;  %v622_v52 = vadd.f32 0.00021858087, %v606_v27  ;;  %v623_v17 = vadd.f32 0.00021858087, %v607_v29  ;;  %v1857_v12 = vsel %vm765_vm0, %v1694_v51, %v764_v50 }
  0x9e   :  { %v624_v16 = vadd.f32 0.00021858087, %v608_v31  ;;  %v625_v62 = vadd.f32 0.00021858087, %v609_v36  ;;  %v626_v13 = vadd.f32 0.00021858087, %v610_v33  ;;  %v1861_v63 = vmul.f32 %v1815_v18, %v1696_v55 }
  0x9f   :  { %v627_v54 = vadd.f32 0.00021858087, %v611_v6  ;;  %v628_v59 = vadd.f32 0.00021858087, %v612_v28  ;;  %v629_v47 = vadd.f32 0.00021858087, %v613_v1  ;;  %v635_v15 = vmul.f32 %v1703_v61, %v619_v21  ;;  %v1870_v6 = vpop.eup %1537 }
  0xa0   :  { %v630_v8 = vadd.f32 0.00021858087, %v614_v11  ;;  %v631_v9 = vadd.f32 0.00021858087, %v615_v24  ;;  %v632_v10 = vadd.f32 0.00021858087, %v616_v37  ;;  %v636_v27 = vmul.f32 %v1706_v5, %v620_v20 }
  0xa1   :  { %v633_v26 = vadd.f32 0.00021858087, %v617_v7  ;;  %v637_v29 = vmul.f32 %v1713_v22, %v621_v3  ;;  %v638_v50 = vmul.f32 %v1716_v23, %v622_v52  ;;  %v634_v31 = vadd.f32 0.00021858087, %v618_v53 }
  0xa2   :  { %v639_v36 = vmul.f32 %v1729_v41, %v623_v17  ;;  %v640_v33 = vmul.f32 %v1732_v42, %v624_v16  ;;  %v641_v18 = vmul.f32 %v1735_v43, %v625_v62  ;;  %v642_v28 = vmul.f32 %v1738_v44, %v626_v13 }
  0xa3   :  { %v643_v1 = vmul.f32 %v1741_v45, %v627_v54  ;;  %v644_v11 = vmul.f32 %v1748_v48, %v628_v59  ;;  %v645_v24 = vmul.f32 %v1751_v49, %v629_v47  ;;  %v646_v37 = vmul.f32 %v1761_v57, %v630_v8 }
  0xa4   :  { %v647_v7 = vmul.f32 %v1764_v58, %v631_v9  ;;  %v648_v21 = vmul.f32 %v1769_v0, %v632_v10  ;;  %v651_v20 = vadd.f32 -0.001253725, %v635_v15  ;;  %v649_v53 = vmul.f32 %v1772_v2, %v633_v26 }
  0xa5   :  { %v652_v3 = vadd.f32 -0.001253725, %v636_v27  ;;  %v653_v52 = vadd.f32 -0.001253725, %v637_v29  ;;  %v654_v17 = vadd.f32 -0.001253725, %v638_v50  ;;  %v650_v16 = vmul.f32 %v1775_v4, %v634_v31 }
  0xa6   :  { %v655_v62 = vadd.f32 -0.001253725, %v639_v36  ;;  %v656_v13 = vadd.f32 -0.001253725, %v640_v33  ;;  %v657_v54 = vadd.f32 -0.001253725, %v641_v18  ;;  %v1883_v8 = vmul.f32 %v1820_v40, %v1698_v56 }
  0xa7   :  { %v658_v59 = vadd.f32 -0.001253725, %v642_v28  ;;  %v659_v46 = vadd.f32 -0.001253725, %v643_v1  ;;  %v660_v47 = vadd.f32 -0.001253725, %v644_v11  ;;  %v667_v26 = vmul.f32 %v1703_v61, %v651_v20 }
  0xa8   :  { %v661_v9 = vadd.f32 -0.001253725, %v645_v24  ;;  %v662_v10 = vadd.f32 -0.001253725, %v646_v37  ;;  %v663_v15 = vadd.f32 -0.001253725, %v647_v7  ;;  %v668_v50 = vmul.f32 %v1706_v5, %v652_v3 }
  0xa9   :  { %v664_v27 = vadd.f32 -0.001253725, %v648_v21  ;;  %v665_v29 = vadd.f32 -0.001253725, %v649_v53  ;;  %v669_v31 = vmul.f32 %v1713_v22, %v653_v52  ;;  %v666_v36 = vadd.f32 -0.001253725, %v650_v16 }
  0xaa   :  { %v670_v33 = vmul.f32 %v1716_v23, %v654_v17  ;;  %v671_v18 = vmul.f32 %v1729_v41, %v655_v62  ;;  %v672_v28 = vmul.f32 %v1732_v42, %v656_v13  ;;  %v673_v40 = vmul.f32 %v1735_v43, %v657_v54 }
  0xab   :  { %v674_v1 = vmul.f32 %v1738_v44, %v658_v59  ;;  %v675_v11 = vmul.f32 %v1741_v45, %v659_v46  ;;  %v676_v24 = vmul.f32 %v1748_v48, %v660_v47  ;;  %v677_v37 = vmul.f32 %v1751_v49, %v661_v9 }
  0xac   :  { %v678_v7 = vmul.f32 %v1761_v57, %v662_v10  ;;  %v679_v21 = vmul.f32 %v1764_v58, %v663_v15  ;;  %v683_v20 = vadd.f32 -0.0041776816, %v667_v26  ;;  %v680_v53 = vmul.f32 %v1769_v0, %v664_v27 }
  0xad   :  { %v681_v3 = vmul.f32 %v1772_v2, %v665_v29  ;;  %v684_v52 = vadd.f32 -0.0041776816, %v668_v50  ;;  %v685_v17 = vadd.f32 -0.0041776816, %v669_v31  ;;  %v682_v16 = vmul.f32 %v1775_v4, %v666_v36 }
  0xae   :  { %v686_v62 = vadd.f32 -0.0041776816, %v670_v33  ;;  %v687_v13 = vadd.f32 -0.0041776816, %v671_v18  ;;  %v688_v46 = vadd.f32 -0.0041776816, %v672_v28  ;;  %v1903_v9 = vmul.f32 %v1826_v25, %v1700_v60 }
  0xaf   :  { %v689_v54 = vadd.f32 -0.0041776816, %v673_v40  ;;  %v690_v59 = vadd.f32 -0.0041776816, %v674_v1  ;;  %v691_v47 = vadd.f32 -0.0041776816, %v675_v11  ;;  %v699_v27 = vmul.f32 %v1703_v61, %v683_v20 }
  0xb0   :  { %v692_v10 = vadd.f32 -0.0041776816, %v676_v24  ;;  %v693_v15 = vadd.f32 -0.0041776816, %v677_v37  ;;  %v694_v26 = vadd.f32 -0.0041776816, %v678_v7  ;;  %v700_v36 = vmul.f32 %v1706_v5, %v684_v52 }
  0xb1   :  { %v695_v29 = vadd.f32 -0.0041776816, %v679_v21  ;;  %v696_v50 = vadd.f32 -0.0041776816, %v680_v53  ;;  %v697_v31 = vadd.f32 -0.0041776816, %v681_v3  ;;  %v701_v18 = vmul.f32 %v1713_v22, %v685_v17 }
  0xb2   :  { %v698_v33 = vadd.f32 -0.0041776816, %v682_v16  ;;  %v702_v28 = vmul.f32 %v1716_v23, %v686_v62  ;;  %v703_v40 = vmul.f32 %v1729_v41, %v687_v13  ;;  %v704_v25 = vmul.f32 %v1732_v42, %v688_v46 }
  0xb3   :  { %v705_v1 = vmul.f32 %v1735_v43, %v689_v54  ;;  %v706_v11 = vmul.f32 %v1738_v44, %v690_v59  ;;  %v707_v24 = vmul.f32 %v1741_v45, %v691_v47  ;;  %v708_v37 = vmul.f32 %v1748_v48, %v692_v10 }
  0xb4   :  { %v709_v7 = vmul.f32 %v1751_v49, %v693_v15  ;;  %v710_v21 = vmul.f32 %v1761_v57, %v694_v26  ;;  %v715_v20 = vadd.f32 0.24664073, %v699_v27  ;;  %v711_v53 = vmul.f32 %v1764_v58, %v695_v29 }
  0xb5   :  { %v712_v3 = vmul.f32 %v1769_v0, %v696_v50  ;;  %v713_v52 = vmul.f32 %v1772_v2, %v697_v31  ;;  %v716_v17 = vadd.f32 0.24664073, %v700_v36  ;;  %v714_v16 = vmul.f32 %v1775_v4, %v698_v33 }
  0xb6   :  { %v717_v62 = vadd.f32 0.24664073, %v701_v18  ;;  %v718_v13 = vadd.f32 0.24664073, %v702_v28  ;;  %v1923_v46 = vmul.f32 %v1845_v32, %v1708_v14  ;;  %v719_v54 = vadd.f32 0.24664073, %v703_v40 }
  0xb7   :  { %v720_v59 = vadd.f32 0.24664073, %v704_v25  ;;  %v721_v47 = vadd.f32 0.24664073, %v705_v1  ;;  %v1927_v10 = vmul.f32 %v1870_v6, %v1710_v19  ;;  %v722_v15 = vadd.f32 0.24664073, %v706_v11 }
  0xb8   :  { %v723_v26 = vadd.f32 0.24664073, %v707_v24  ;;  %v724_v27 = vadd.f32 0.24664073, %v708_v37  ;;  %v731_v29 = vmul.f32 %v1703_v61, %v715_v20  ;;  %v725_v50 = vadd.f32 0.24664073, %v709_v7 }
  0xb9   :  { %v726_v31 = vadd.f32 0.24664073, %v710_v21  ;;  %v727_v36 = vadd.f32 0.24664073, %v711_v53  ;;  %v732_v33 = vmul.f32 %v1706_v5, %v716_v17  ;;  %v728_v18 = vadd.f32 0.24664073, %v712_v3 }
  0xba   :  { %v729_v32 = vadd.f32 0.24664073, %v713_v52  ;;  %v730_v28 = vadd.f32 0.24664073, %v714_v16  ;;  %v733_v40 = vmul.f32 %v1713_v22, %v717_v62  ;;  %v734_v25 = vmul.f32 %v1716_v23, %v718_v13 }
  0xbb   :  { %v735_v6 = vmul.f32 %v1729_v41, %v719_v54  ;;  %v736_v1 = vmul.f32 %v1732_v42, %v720_v59  ;;  %v737_v61 = vmul.f32 %v1735_v43, %v721_v47  ;;  %v738_v11 = vmul.f32 %v1738_v44, %v722_v15 }
  0xbc   :  { %v739_v24 = vmul.f32 %v1741_v45, %v723_v26  ;;  %v740_v5 = vmul.f32 %v1748_v48, %v724_v27  ;;  %v741_v22 = vmul.f32 %v1751_v49, %v725_v50  ;;  %v742_v23 = vmul.f32 %v1761_v57, %v726_v31 }
  0xbd   :  { %1543 = vrsqrt.f32 %v1722_v35  ;;  %v743_v41 = vmul.f32 %v1764_v58, %v727_v36  ;;  %v1945_v42 = vadd.f32 1.5014094, %v731_v29  ;;  %v1947_v37 = vadd.f32 1.5014094, %v732_v33 }
  0xbe   :  { %1545 = vrsqrt.f32 %v1724_v38  ;;  %v744_v43 = vmul.f32 %v1769_v0, %v728_v18  ;;  %v1951_v44 = vadd.f32 1.5014094, %v733_v40  ;;  %v1953_v45 = vadd.f32 1.5014094, %v734_v25 }
  0xbf   :  { %2399 = vst [vmem:[#allocation32_spill] sm:$0xff] %v1945_v42  ;;  %2400 = vst [vmem:[#allocation33_spill] sm:$0xff] %v1947_v37  ;;  %v1955_v48 = vadd.f32 1.5014094, %v735_v6  ;;  %v745_v49 = vmul.f32 %v1772_v2, %v729_v32  ;;  %v1958_v57 = vadd.f32 1.5014094, %v736_v1  ;;  %v746_v21 = vmul.f32 %v1775_v4, %v730_v28 }
  0xc0   :  { %2401 = vst [vmem:[#allocation34_spill] sm:$0xff] %v1951_v44  ;;  %2402 = vst [vmem:[#allocation35_spill] sm:$0xff] %v1953_v45  ;;  %v1960_v7 = vadd.f32 1.5014094, %v737_v61  ;;  %v1962_v58 = vadd.f32 1.5014094, %v738_v11  ;;  %1547 = vrsqrt.f32 %v1726_v39 }
  0xc1   :  { %2403 = vst [vmem:[#allocation36_spill] sm:$0xff] %v1955_v48  ;;  %2404 = vst [vmem:[#allocation37_spill] sm:$0xff] %v1958_v57  ;;  %v1965_v20 = vadd.f32 1.5014094, %v739_v24  ;;  %v1967_v53 = vadd.f32 1.5014094, %v740_v5 }
  0xc2   :  { %2405 = vst [vmem:[#allocation38_spill] sm:$0xff] %v1960_v7  ;;  %2406 = vst [vmem:[#allocation39_spill] sm:$0xff] %v1962_v58  ;;  %v1969_v0 = vadd.f32 1.5014094, %v741_v22  ;;  %v1971_v3 = vadd.f32 1.5014094, %v742_v23 }
  0xc3   :  { %2407 = vst [vmem:[#allocation40_spill] sm:$0xff] %v1965_v20  ;;  %2408 = vst [vmem:[#allocation41_spill] sm:$0xff] %v1967_v53  ;;  %v1973_v52 = vadd.f32 1.5014094, %v743_v41  ;;  %vm772_vm1 = vcmp.eq.f32.partialorder %v1696_v55, inf  ;;  %vm779_vm2 = vcmp.eq.f32.partialorder %v1698_v56, inf }
  0xc4   :  { %2409 = vst [vmem:[#allocation42_spill] sm:$0xff] %v1969_v0  ;;  %2410 = vst [vmem:[#allocation43_spill] sm:$0xff] %v1971_v3  ;;  %v1977_v2 = vadd.f32 1.5014094, %v744_v43  ;;  %vm767_vm3 = vcmp.eq.f32.partialorder %v1694_v51, 0.0  ;;  %v768_v4 = vand.u32 2147483648, %v1694_v51  ;;  %v773_v62 = vsel %vm772_vm1, %v1696_v55, %v1861_v63 }
  0xc5   :  { %2411 = vst [vmem:[#allocation44_spill] sm:$0xff] %v1973_v52  ;;  %vm786_vm4 = vcmp.eq.f32.partialorder %v1700_v60, inf  ;;  %vm774_vm5 = vcmp.eq.f32.partialorder %v1696_v55, 0.0  ;;  %v775_v17 = vand.u32 2147483648, %v1696_v55  ;;  %v782_v16 = vand.u32 2147483648, %v1698_v56  ;;  %v2416_v11 = vld [vmem:[#allocation28_spill] sm:$0xff] }
  0xc6   :  { %2412 = vst [vmem:[#allocation45_spill] sm:$0xff] %v1977_v2  ;;  %vm793_vm6 = vcmp.eq.f32.partialorder %v1708_v14, inf  ;;  %v780_v13 = vsel %vm779_vm2, %v1698_v56, %v1883_v8  ;;  %vm781_vm7 = vcmp.eq.f32.partialorder %v1698_v56, 0.0  ;;  %v789_v54 = vand.u32 2147483648, %v1700_v60  ;;  %v1540_v8 = vpop.eup %1539  ;;  %v2417_v43 = vld [vmem:[#allocation29_spill] sm:$0xff] }
  0xc7   :  { %v787_v59 = vsel %vm786_vm4, %v1700_v60, %v1903_v9  ;;  %vm788_vm8 = vcmp.eq.f32.partialorder %v1700_v60, 0.0  ;;  %v796_v47 = vand.u32 2147483648, %v1708_v14  ;;  %vm800_vm9 = vcmp.eq.f32.partialorder %v1710_v19, inf  ;;  %v1542_v31 = vpop.eup %1541 }
  0xc8   :  { %v1997_v15 = vadd.f32 1.5014094, %v745_v49  ;;  %v1999_v26 = vadd.f32 1.5014094, %v746_v21  ;;  %v794_v63 = vsel %vm793_vm6, %v1708_v14, %v1923_v46  ;;  %vm795_vm10 = vcmp.eq.f32.partialorder %v1708_v14, 0.0  ;;  %v2418_v21 = vld [vmem:[#allocation30_spill] sm:$0xff] }
  0xc9   :  { %v769_v9 = vsel %vm767_vm3, %v768_v4, %v1857_v12  ;;  %v776_v27 = vsel %vm774_vm5, %v775_v17, %v773_v62  ;;  %v783_v29 = vsel %vm781_vm7, %v782_v16, %v780_v13  ;;  %v803_v50 = vand.u32 2147483648, %v1710_v19  ;;  %v2419_v16 = vld [vmem:[#allocation31_spill] sm:$0xff] }
  0xca   :  { %2413 = vst [vmem:[#allocation46_spill] sm:$0xff] %v1997_v15  ;;  %2414 = vst [vmem:[#allocation47_spill] sm:$0xff] %v1999_v26  ;;  %v790_v36 = vsel %vm788_vm8, %v789_v54, %v787_v59  ;;  %v801_v33 = vsel %vm800_vm9, %v1710_v19, %v1927_v10  ;;  %vm802_vm11 = vcmp.eq.f32.partialorder %v1710_v19, 0.0  ;;  %v1544_v46 = vpop.eup %1543  ;;  %v797_v18 = vsel %vm795_vm10, %v796_v47, %v794_v63  ;;  %v2415_v10 = vld [vmem:[#allocation27_spill] sm:$0xff] }
  0xcb   :  { %v806_v32 = vmul.f32 %v1540_v8, %v1718_v30  ;;  %vm807_vm12 = vcmp.eq.f32.partialorder %v1718_v30, inf  ;;  %vm809_vm13 = vcmp.eq.f32.partialorder %v1718_v30, 0.0  ;;  %v1546_v12 = vpop.eup %1545  ;;  %v810_v28 = vand.u32 2147483648, %v1718_v30 }
  0xcc   :  { %v813_v40 = vmul.f32 %v1542_v31, %v1720_v34  ;;  %v820_v25 = vmul.f32 %v1544_v46, %v1722_v35  ;;  %1549 = vrsqrt.f32 %v2415_v10  ;;  %v804_v6 = vsel %vm802_vm11, %v803_v50, %v801_v33 }
  0xcd   :  { %vm814_vm14 = vcmp.eq.f32.partialorder %v1720_v34, inf  ;;  %vm821_vm15 = vcmp.eq.f32.partialorder %v1722_v35, inf  ;;  %v827_v1 = vmul.f32 %v1546_v12, %v1724_v38  ;;  %vm816_vm0 = vcmp.eq.f32.partialorder %v1720_v34, 0.0  ;;  %v1548_v12 = vpop.eup %1547 }
  0xce   :  { %v817_v61 = vand.u32 2147483648, %v1720_v34  ;;  %vm828_vm1 = vcmp.eq.f32.partialorder %v1724_v38, inf  ;;  %1551 = vrsqrt.f32 %v2416_v11  ;;  %v808_v24 = vsel %vm807_vm12, %v1718_v30, %v806_v32 }
  0xcf   :  { %vm823_vm2 = vcmp.eq.f32.partialorder %v1722_v35, 0.0  ;;  %v824_v5 = vand.u32 2147483648, %v1722_v35  ;;  %vm830_vm3 = vcmp.eq.f32.partialorder %v1724_v38, 0.0  ;;  %v815_v22 = vsel %vm814_vm14, %v1720_v34, %v813_v40 }
  0xd0   :  { %v822_v23 = vsel %vm821_vm15, %v1722_v35, %v820_v25  ;;  %v831_v41 = vand.u32 2147483648, %v1724_v38  ;;  %1553 = vrsqrt.f32 %v2417_v43  ;;  %v829_v49 = vsel %vm828_vm1, %v1724_v38, %v827_v1 }
  0xd1   :  { %vm835_vm4 = vcmp.eq.f32.partialorder %v1726_v39, inf  ;;  %vm837_vm5 = vcmp.eq.f32.partialorder %v1726_v39, 0.0  ;;  %1555 = vrsqrt.f32 %v2418_v21  ;;  %v811_v4 = vsel %vm809_vm13, %v810_v28, %v808_v24 }
  0xd2   :  { %v838_v17 = vand.u32 2147483648, %v1726_v39  ;;  %vm842_vm6 = vcmp.eq.f32.partialorder %v2415_v10, inf  ;;  %1557 = vrsqrt.f32 %v2419_v16  ;;  %v818_v62 = vsel %vm816_vm0, %v817_v61, %v815_v22 }
  0xd3   :  { %v825_v13 = vsel %vm823_vm2, %v824_v5, %v822_v23  ;;  %vm844_vm7 = vcmp.eq.f32.partialorder %v2415_v10, 0.0  ;;  %v845_v54 = vand.u32 2147483648, %v2415_v10  ;;  %v832_v59 = vsel %vm830_vm3, %v831_v41, %v829_v49 }
  0xd4   :  { %vm849_vm8 = vcmp.eq.f32.partialorder %v2416_v11, inf  ;;  %vm851_vm9 = vcmp.eq.f32.partialorder %v2416_v11, 0.0  ;;  %v852_v47 = vand.u32 2147483648, %v2416_v11  ;;  %vm856_vm10 = vcmp.eq.f32.partialorder %v2417_v43, inf }
  0xd5   :  { %v859_v63 = vand.u32 2147483648, %v2417_v43  ;;  %v2058_v8 = vadd.f32 -3.0, %v769_v9  ;;  %v2060_v50 = vadd.f32 -3.0, %v776_v27  ;;  %v2062_v31 = vadd.f32 -3.0, %v783_v29 }
  0xd6   :  { %vm858_vm11 = vcmp.eq.f32.partialorder %v2417_v43, 0.0  ;;  %vm863_vm12 = vcmp.eq.f32.partialorder %v2418_v21, inf  ;;  %v866_v33 = vand.u32 2147483648, %v2418_v21  ;;  %v2067_v46 = vadd.f32 -3.0, %v790_v36 }
  0xd7   :  { %v2069_v32 = vadd.f32 -3.0, %v797_v18  ;;  %vm865_vm13 = vcmp.eq.f32.partialorder %v2418_v21, 0.0  ;;  %vm870_vm14 = vcmp.eq.f32.partialorder %v2419_v16, inf  ;;  %v2073_v9 = vadd.f32 -3.0, %v804_v6 }
  0xd8   :  { %v2075_v27 = vadd.f32 -3.0, %v811_v4  ;;  %v2077_v29 = vadd.f32 -3.0, %v818_v62  ;;  %v834_v28 = vmul.f32 %v1548_v12, %v1726_v39  ;;  %vm872_vm15 = vcmp.eq.f32.partialorder %v2419_v16, 0.0 }
  0xd9   :  { %v873_v36 = vand.u32 2147483648, %v2419_v16  ;;  %v2082_v40 = vadd.f32 -3.0, %v825_v13  ;;  %v2084_v18 = vadd.f32 -3.0, %v832_v59  ;;  %v1550_v25 = vpop.eup %1549  ;;  %v891_v1 = vmul.f32 -0.00020021426, %v2058_v8 }
  0xda   :  { %v892_v6 = vmul.f32 -0.00020021426, %v2060_v50  ;;  %v893_v61 = vmul.f32 -0.00020021426, %v2062_v31  ;;  %v836_v24 = vsel %vm835_vm4, %v1726_v39, %v834_v28  ;;  %v841_v5 = vmul.f32 %v1550_v25, %v2415_v10 }
  0xdb   :  { %v894_v22 = vmul.f32 -0.00020021426, %v2067_v46  ;;  %v895_v23 = vmul.f32 -0.00020021426, %v2069_v32  ;;  %v1552_v41 = vpop.eup %1551  ;;  %v839_v49 = vsel %vm837_vm5, %v838_v17, %v836_v24  ;;  %v896_v4 = vmul.f32 -0.00020021426, %v2073_v9 }
  0xdc   :  { %v897_v62 = vmul.f32 -0.00020021426, %v2075_v27  ;;  %v898_v13 = vmul.f32 -0.00020021426, %v2077_v29  ;;  %v843_v59 = vsel %vm842_vm6, %v2415_v10, %v841_v5  ;;  %v848_v12 = vmul.f32 %v1552_v41, %v2416_v11 }
  0xdd   :  { %v899_v28 = vmul.f32 -0.00020021426, %v2082_v40  ;;  %v900_v25 = vmul.f32 -0.00020021426, %v2084_v18  ;;  %v1554_v26 = vpop.eup %1553  ;;  %v846_v17 = vsel %vm844_vm7, %v845_v54, %v843_v59  ;;  %v2108_v24 = vadd.f32 -3.0, %v839_v49 }
  0xde   :  { %v907_v15 = vadd.f32 0.00010095056, %v891_v1  ;;  %v908_v2 = vadd.f32 0.00010095056, %v892_v6  ;;  %v1556_v52 = vpop.eup %1555  ;;  %v850_v3 = vsel %vm849_vm8, %v2416_v11, %v848_v12  ;;  %v855_v5 = vmul.f32 %v1554_v26, %v2417_v43 }
  0xdf   :  { %v2114_v41 = vadd.f32 -3.0, %v846_v17  ;;  %v909_v0 = vadd.f32 0.00010095056, %v893_v61  ;;  %v1558_v53 = vpop.eup %1557  ;;  %v853_v20 = vsel %vm851_vm9, %v852_v47, %v850_v3  ;;  %v862_v54 = vmul.f32 %v1556_v52, %v2418_v21 }
  0xe0   :  { %v910_v49 = vadd.f32 0.00010095056, %v894_v22  ;;  %v911_v59 = vadd.f32 0.00010095056, %v895_v23  ;;  %v857_v1 = vsel %vm856_vm10, %v2417_v43, %v855_v5  ;;  %v869_v6 = vmul.f32 %v1558_v53, %v2419_v16 }
  0xe1   :  { %v2123_v12 = vadd.f32 -3.0, %v853_v20  ;;  %v912_v26 = vadd.f32 0.00010095056, %v896_v4  ;;  %v860_v61 = vsel %vm858_vm11, %v859_v63, %v857_v1  ;;  %v864_v3 = vsel %vm863_vm12, %v2418_v21, %v862_v54 }
  0xe2   :  { %v901_v52 = vmul.f32 -0.00020021426, %v2108_v24  ;;  %v902_v47 = vmul.f32 -0.00020021426, %v2114_v41  ;;  %v867_v22 = vsel %vm865_vm13, %v866_v33, %v864_v3  ;;  %v871_v20 = vsel %vm870_vm14, %v2419_v16, %v869_v6 }
  0xe3   :  { %v2137_v53 = vadd.f32 -3.0, %v860_v61  ;;  %v903_v23 = vmul.f32 -0.00020021426, %v2123_v12  ;;  %v874_v63 = vsel %vm872_vm15, %v873_v36, %v871_v20  ;;  %v2142_v4 = vadd.f32 -3.0, %v867_v22 }
  0xe4   :  { %v913_v17 = vadd.f32 0.00010095056, %v897_v62  ;;  %v914_v5 = vadd.f32 0.00010095056, %v898_v13  ;;  %v2144_v54 = vadd.f32 -3.0, %v874_v63  ;;  %v923_v48 = vmul.f32 %v2058_v8, %v907_v15 }
  0xe5   :  { %v904_v1 = vmul.f32 -0.00020021426, %v2137_v53  ;;  %v915_v33 = vadd.f32 0.00010095056, %v899_v28  ;;  %v905_v3 = vmul.f32 -0.00020021426, %v2142_v4  ;;  %v924_v22 = vmul.f32 %v2060_v50, %v908_v2 }
  0xe6   :  { %v916_v58 = vadd.f32 0.00010095056, %v900_v25  ;;  %v917_v6 = vadd.f32 0.00010095056, %v901_v52  ;;  %v906_v61 = vmul.f32 -0.00020021426, %v2144_v54  ;;  %v925_v62 = vmul.f32 %v2062_v31, %v909_v0 }
  0xe7   :  { %v918_v7 = vadd.f32 0.00010095056, %v902_v47  ;;  %v919_v57 = vadd.f32 0.00010095056, %v903_v23  ;;  %v920_v36 = vadd.f32 0.00010095056, %v904_v1  ;;  %v926_v13 = vmul.f32 %v2067_v46, %v910_v49 }
  0xe8   :  { %v921_v20 = vadd.f32 0.00010095056, %v905_v3  ;;  %v927_v28 = vmul.f32 %v2069_v32, %v911_v59  ;;  %v928_v63 = vmul.f32 %v2073_v9, %v912_v26  ;;  %v929_v25 = vmul.f32 %v2075_v27, %v913_v17 }
  0xe9   :  { %v922_v52 = vadd.f32 0.00010095056, %v906_v61  ;;  %v930_v47 = vmul.f32 %v2077_v29, %v914_v5  ;;  %v931_v23 = vmul.f32 %v2082_v40, %v915_v33  ;;  %v932_v15 = vmul.f32 %v2084_v18, %v916_v58 }
  0xea   :  { %v933_v2 = vmul.f32 %v2108_v24, %v917_v6  ;;  %v934_v0 = vmul.f32 %v2114_v41, %v918_v7  ;;  %v935_v49 = vmul.f32 %v2123_v12, %v919_v57  ;;  %v939_v1 = vadd.f32 0.0013493432, %v923_v48 }
  0xeb   :  { %v936_v59 = vmul.f32 %v2137_v53, %v920_v36  ;;  %v940_v3 = vadd.f32 0.0013493432, %v924_v22  ;;  %v941_v26 = vadd.f32 0.0013493432, %v925_v62  ;;  %v942_v45 = vadd.f32 0.0013493432, %v926_v13 }
  0xec   :  { %v937_v17 = vmul.f32 %v2142_v4, %v921_v20  ;;  %v943_v61 = vadd.f32 0.0013493432, %v927_v28  ;;  %v944_v5 = vadd.f32 0.0013493432, %v928_v63  ;;  %v945_v44 = vadd.f32 0.0013493432, %v929_v25 }
  0xed   :  { %v938_v33 = vmul.f32 %v2144_v54, %v922_v52  ;;  %v946_v58 = vadd.f32 0.0013493432, %v930_v47  ;;  %v947_v37 = vadd.f32 0.0013493432, %v931_v23  ;;  %v948_v6 = vadd.f32 0.0013493432, %v932_v15 }
  0xee   :  { %v949_v42 = vadd.f32 0.0013493432, %v933_v2  ;;  %v950_v7 = vadd.f32 0.0013493432, %v934_v0  ;;  %v951_v16 = vadd.f32 0.0013493432, %v935_v49  ;;  %v955_v48 = vmul.f32 %v2058_v8, %v939_v1 }
  0xef   :  { %v952_v57 = vadd.f32 0.0013493432, %v936_v59  ;;  %v956_v36 = vmul.f32 %v2060_v50, %v940_v3  ;;  %v957_v22 = vmul.f32 %v2062_v31, %v941_v26  ;;  %v958_v62 = vmul.f32 %v2067_v46, %v942_v45 }
  0xf0   :  { %v953_v13 = vadd.f32 0.0013493432, %v937_v17  ;;  %v959_v20 = vmul.f32 %v2069_v32, %v943_v61  ;;  %v960_v28 = vmul.f32 %v2073_v9, %v944_v5  ;;  %v961_v63 = vmul.f32 %v2075_v27, %v945_v44 }
  0xf1   :  { %v954_v25 = vadd.f32 0.0013493432, %v938_v33  ;;  %v962_v52 = vmul.f32 %v2077_v29, %v946_v58  ;;  %v963_v47 = vmul.f32 %v2082_v40, %v947_v37  ;;  %v964_v23 = vmul.f32 %v2084_v18, %v948_v6 }
  0xf2   :  { %v965_v15 = vmul.f32 %v2108_v24, %v949_v42  ;;  %v966_v2 = vmul.f32 %v2114_v41, %v950_v7  ;;  %v967_v45 = vmul.f32 %v2123_v12, %v951_v16  ;;  %v971_v0 = vadd.f32 -0.0036734284, %v955_v48 }
  0xf3   :  { %v968_v49 = vmul.f32 %v2137_v53, %v952_v57  ;;  %v972_v1 = vadd.f32 -0.0036734284, %v956_v36  ;;  %v973_v59 = vadd.f32 -0.0036734284, %v957_v22  ;;  %v974_v3 = vadd.f32 -0.0036734284, %v958_v62 }
  0xf4   :  { %v969_v44 = vmul.f32 %v2142_v4, %v953_v13  ;;  %v975_v26 = vadd.f32 -0.0036734284, %v959_v20  ;;  %v976_v17 = vadd.f32 -0.0036734284, %v960_v28  ;;  %v977_v61 = vadd.f32 -0.0036734284, %v961_v63 }
  0xf5   :  { %v970_v37 = vmul.f32 %v2144_v54, %v954_v25  ;;  %v978_v5 = vadd.f32 -0.0036734284, %v962_v52  ;;  %v979_v33 = vadd.f32 -0.0036734284, %v963_v47  ;;  %v980_v42 = vadd.f32 -0.0036734284, %v964_v23 }
  0xf6   :  { %v981_v58 = vadd.f32 -0.0036734284, %v965_v15  ;;  %v982_v6 = vadd.f32 -0.0036734284, %v966_v2  ;;  %v983_v7 = vadd.f32 -0.0036734284, %v967_v45  ;;  %v987_v16 = vmul.f32 %v2058_v8, %v971_v0 }
  0xf7   :  { %v984_v48 = vadd.f32 -0.0036734284, %v968_v49  ;;  %v988_v57 = vmul.f32 %v2060_v50, %v972_v1  ;;  %v989_v36 = vmul.f32 %v2062_v31, %v973_v59  ;;  %v990_v22 = vmul.f32 %v2067_v46, %v974_v3 }
  0xf8   :  { %v985_v62 = vadd.f32 -0.0036734284, %v969_v44  ;;  %v991_v13 = vmul.f32 %v2069_v32, %v975_v26  ;;  %v992_v20 = vmul.f32 %v2073_v9, %v976_v17  ;;  %v993_v28 = vmul.f32 %v2075_v27, %v977_v61 }
  0xf9   :  { %v986_v63 = vadd.f32 -0.0036734284, %v970_v37  ;;  %v994_v25 = vmul.f32 %v2077_v29, %v978_v5  ;;  %v995_v52 = vmul.f32 %v2082_v40, %v979_v33  ;;  %v996_v47 = vmul.f32 %v2084_v18, %v980_v42 }
  0xfa   :  { %v997_v23 = vmul.f32 %v2108_v24, %v981_v58  ;;  %v998_v15 = vmul.f32 %v2114_v41, %v982_v6  ;;  %v999_v2 = vmul.f32 %v2123_v12, %v983_v7  ;;  %v1003_v45 = vadd.f32 0.0057395077, %v987_v16 }
  0xfb   :  { %v1000_v0 = vmul.f32 %v2137_v53, %v984_v48  ;;  %v1004_v49 = vadd.f32 0.0057395077, %v988_v57  ;;  %v1005_v1 = vadd.f32 0.0057395077, %v989_v36  ;;  %v1006_v59 = vadd.f32 0.0057395077, %v990_v22 }
  0xfc   :  { %v1001_v3 = vmul.f32 %v2142_v4, %v985_v62  ;;  %v1007_v44 = vadd.f32 0.0057395077, %v991_v13  ;;  %v1008_v26 = vadd.f32 0.0057395077, %v992_v20  ;;  %v1009_v17 = vadd.f32 0.0057395077, %v993_v28 }
  0xfd   :  { %v1002_v61 = vmul.f32 %v2144_v54, %v986_v63  ;;  %v1010_v37 = vadd.f32 0.0057395077, %v994_v25  ;;  %v1011_v5 = vadd.f32 0.0057395077, %v995_v52  ;;  %v1012_v33 = vadd.f32 0.0057395077, %v996_v47 }
  0xfe   :  { %v1013_v42 = vadd.f32 0.0057395077, %v997_v23  ;;  %v1014_v58 = vadd.f32 0.0057395077, %v998_v15  ;;  %v1015_v6 = vadd.f32 0.0057395077, %v999_v2  ;;  %v1019_v16 = vmul.f32 %v2058_v8, %v1003_v45 }
  0xff   :  { %v1016_v7 = vadd.f32 0.0057395077, %v1000_v0  ;;  %v1020_v48 = vmul.f32 %v2060_v50, %v1004_v49  ;;  %v1021_v57 = vmul.f32 %v2062_v31, %v1005_v1  ;;  %v1017_v36 = vadd.f32 0.0057395077, %v1001_v3 }
 0x100   :  { %v1022_v22 = vmul.f32 %v2067_v46, %v1006_v59  ;;  %v1023_v62 = vmul.f32 %v2069_v32, %v1007_v44  ;;  %v1024_v13 = vmul.f32 %v2073_v9, %v1008_v26  ;;  %v1018_v20 = vadd.f32 0.0057395077, %v1002_v61 }
 0x101   :  { %v1025_v28 = vmul.f32 %v2075_v27, %v1009_v17  ;;  %v1026_v63 = vmul.f32 %v2077_v29, %v1010_v37  ;;  %v1027_v25 = vmul.f32 %v2082_v40, %v1011_v5  ;;  %v1028_v52 = vmul.f32 %v2084_v18, %v1012_v33 }
 0x102   :  { %v1029_v47 = vmul.f32 %v2108_v24, %v1013_v42  ;;  %v1030_v23 = vmul.f32 %v2114_v41, %v1014_v58  ;;  %v1031_v15 = vmul.f32 %v2123_v12, %v1015_v6  ;;  %v1032_v2 = vmul.f32 %v2137_v53, %v1016_v7 }
 0x103   :  { %v1035_v45 = vadd.f32 -0.0076224613, %v1019_v16  ;;  %v1036_v0 = vadd.f32 -0.0076224613, %v1020_v48  ;;  %v1037_v49 = vadd.f32 -0.0076224613, %v1021_v57  ;;  %v1033_v1 = vmul.f32 %v2142_v4, %v1017_v36 }
 0x104   :  { %v1038_v59 = vadd.f32 -0.0076224613, %v1022_v22  ;;  %v1039_v3 = vadd.f32 -0.0076224613, %v1023_v62  ;;  %v1040_v44 = vadd.f32 -0.0076224613, %v1024_v13  ;;  %v1034_v26 = vmul.f32 %v2144_v54, %v1018_v20 }
 0x105   :  { %v1041_v17 = vadd.f32 -0.0076224613, %v1025_v28  ;;  %v1042_v61 = vadd.f32 -0.0076224613, %v1026_v63  ;;  %v1043_v37 = vadd.f32 -0.0076224613, %v1027_v25  ;;  %v1051_v7 = vmul.f32 %v2058_v8, %v1035_v45 }
 0x106   :  { %v1044_v5 = vadd.f32 -0.0076224613, %v1028_v52  ;;  %v1045_v33 = vadd.f32 -0.0076224613, %v1029_v47  ;;  %v1046_v42 = vadd.f32 -0.0076224613, %v1030_v23  ;;  %v1052_v16 = vmul.f32 %v2060_v50, %v1036_v0 }
 0x107   :  { %v1047_v58 = vadd.f32 -0.0076224613, %v1031_v15  ;;  %v1048_v6 = vadd.f32 -0.0076224613, %v1032_v2  ;;  %v1049_v48 = vadd.f32 -0.0076224613, %v1033_v1  ;;  %v1053_v57 = vmul.f32 %v2062_v31, %v1037_v49 }
 0x108   :  { %v1054_v36 = vmul.f32 %v2067_v46, %v1038_v59  ;;  %v1055_v22 = vmul.f32 %v2069_v32, %v1039_v3  ;;  %v1050_v62 = vadd.f32 -0.0076224613, %v1034_v26  ;;  %v1056_v13 = vmul.f32 %v2073_v9, %v1040_v44 }
 0x109   :  { %v1057_v20 = vmul.f32 %v2075_v27, %v1041_v17  ;;  %v1058_v28 = vmul.f32 %v2077_v29, %v1042_v61  ;;  %v1059_v63 = vmul.f32 %v2082_v40, %v1043_v37  ;;  %v1060_v25 = vmul.f32 %v2084_v18, %v1044_v5 }
 0x10a   :  { %v1061_v52 = vmul.f32 %v2108_v24, %v1045_v33  ;;  %v1062_v47 = vmul.f32 %v2114_v41, %v1046_v42  ;;  %v1063_v23 = vmul.f32 %v2123_v12, %v1047_v58  ;;  %v1064_v15 = vmul.f32 %v2137_v53, %v1048_v6 }
 0x10b   :  { %v1067_v2 = vadd.f32 0.0094388705, %v1051_v7  ;;  %v1068_v45 = vadd.f32 0.0094388705, %v1052_v16  ;;  %v1065_v0 = vmul.f32 %v2142_v4, %v1049_v48  ;;  %v1069_v49 = vadd.f32 0.0094388705, %v1053_v57 }
 0x10c   :  { %v1070_v1 = vadd.f32 0.0094388705, %v1054_v36  ;;  %v1071_v59 = vadd.f32 0.0094388705, %v1055_v22  ;;  %v1066_v3 = vmul.f32 %v2144_v54, %v1050_v62  ;;  %v1072_v44 = vadd.f32 0.0094388705, %v1056_v13 }
 0x10d   :  { %v1073_v26 = vadd.f32 0.0094388705, %v1057_v20  ;;  %v1074_v17 = vadd.f32 0.0094388705, %v1058_v28  ;;  %v1075_v61 = vadd.f32 0.0094388705, %v1059_v63  ;;  %v1083_v6 = vmul.f32 %v2058_v8, %v1067_v2 }
 0x10e   :  { %v1076_v37 = vadd.f32 0.0094388705, %v1060_v25  ;;  %v1077_v5 = vadd.f32 0.0094388705, %v1061_v52  ;;  %v1078_v33 = vadd.f32 0.0094388705, %v1062_v47  ;;  %v1084_v16 = vmul.f32 %v2060_v50, %v1068_v45 }
 0x10f   :  { %v1079_v42 = vadd.f32 0.0094388705, %v1063_v23  ;;  %v1080_v58 = vadd.f32 0.0094388705, %v1064_v15  ;;  %v1081_v7 = vadd.f32 0.0094388705, %v1065_v0  ;;  %v1085_v48 = vmul.f32 %v2062_v31, %v1069_v49 }
 0x110   :  { %v1086_v57 = vmul.f32 %v2067_v46, %v1070_v1  ;;  %v1082_v36 = vadd.f32 0.0094388705, %v1066_v3  ;;  %v1087_v22 = vmul.f32 %v2069_v32, %v1071_v59  ;;  %v1088_v62 = vmul.f32 %v2073_v9, %v1072_v44 }
 0x111   :  { %v1089_v13 = vmul.f32 %v2075_v27, %v1073_v26  ;;  %v1090_v20 = vmul.f32 %v2077_v29, %v1074_v17  ;;  %v1091_v28 = vmul.f32 %v2082_v40, %v1075_v61  ;;  %v1092_v63 = vmul.f32 %v2084_v18, %v1076_v37 }
 0x112   :  { %v1093_v25 = vmul.f32 %v2108_v24, %v1077_v5  ;;  %v1094_v52 = vmul.f32 %v2114_v41, %v1078_v33  ;;  %v1095_v47 = vmul.f32 %v2123_v12, %v1079_v42  ;;  %v1096_v23 = vmul.f32 %v2137_v53, %v1080_v58 }
 0x113   :  { %v1099_v15 = vadd.f32 1.001674, %v1083_v6  ;;  %v1097_v2 = vmul.f32 %v2142_v4, %v1081_v7  ;;  %v1100_v45 = vadd.f32 1.001674, %v1084_v16  ;;  %v1101_v0 = vadd.f32 1.001674, %v1085_v48 }
 0x114   :  { %v1102_v49 = vadd.f32 1.001674, %v1086_v57  ;;  %v1098_v1 = vmul.f32 %v2144_v54, %v1082_v36  ;;  %v1103_v59 = vadd.f32 1.001674, %v1087_v22  ;;  %v1104_v3 = vadd.f32 1.001674, %v1088_v62 }
 0x115   :  { %v1105_v44 = vadd.f32 1.001674, %v1089_v13  ;;  %v1106_v26 = vadd.f32 1.001674, %v1090_v20  ;;  %v1107_v17 = vadd.f32 1.001674, %v1091_v28  ;;  %v1115_v58 = vmul.f32 %v2058_v8, %v1099_v15 }
 0x116   :  { %v1108_v61 = vadd.f32 1.001674, %v1092_v63  ;;  %v1109_v37 = vadd.f32 1.001674, %v1093_v25  ;;  %v1110_v5 = vadd.f32 1.001674, %v1094_v52  ;;  %v1116_v6 = vmul.f32 %v2060_v50, %v1100_v45 }
 0x117   :  { %v1111_v33 = vadd.f32 1.001674, %v1095_v47  ;;  %v1112_v42 = vadd.f32 1.001674, %v1096_v23  ;;  %v1113_v21 = vadd.f32 1.001674, %v1097_v2  ;;  %v1117_v16 = vmul.f32 %v2062_v31, %v1101_v0 }
 0x118   :  { %v1114_v7 = vadd.f32 1.001674, %v1098_v1  ;;  %v1118_v48 = vmul.f32 %v2067_v46, %v1102_v49  ;;  %v1119_v57 = vmul.f32 %v2069_v32, %v1103_v59  ;;  %v1120_v36 = vmul.f32 %v2073_v9, %v1104_v3  ;;  %v2423_v0 = vld [vmem:[#allocation33_spill] sm:$0xff]  ;;  %v2424_v1 = vld [vmem:[#allocation34_spill] sm:$0xff]  ;;  %v2425_v3 = vld [vmem:[#allocation35_spill] sm:$0xff] }
 0x119   :  { %v1121_v22 = vmul.f32 %v2075_v27, %v1105_v44  ;;  %v1122_v62 = vmul.f32 %v2077_v29, %v1106_v26  ;;  %v1123_v13 = vmul.f32 %v2082_v40, %v1107_v17  ;;  %v1124_v20 = vmul.f32 %v2084_v18, %v1108_v61  ;;  %v2426_v26 = vld [vmem:[#allocation36_spill] sm:$0xff]  ;;  %v2427_v61 = vld [vmem:[#allocation37_spill] sm:$0xff] }
 0x11a   :  { %v1125_v8 = vmul.f32 %v2108_v24, %v1109_v37  ;;  %v1126_v50 = vmul.f32 %v2114_v41, %v1110_v5  ;;  %v1127_v31 = vmul.f32 %v2123_v12, %v1111_v33  ;;  %v1128_v46 = vmul.f32 %v2137_v53, %v1112_v42  ;;  %v2428_v37 = vld [vmem:[#allocation38_spill] sm:$0xff]  ;;  %v2429_v5 = vld [vmem:[#allocation39_spill] sm:$0xff]  ;;  %v2430_v33 = vld [vmem:[#allocation40_spill] sm:$0xff] }
 0x11b   :  { %v1129_v32 = vmul.f32 %v2142_v4, %v1113_v21  ;;  %v1131_v28 = vadd.f32 2.8329768, %v1115_v58  ;;  %v1132_v9 = vadd.f32 2.8329768, %v1116_v6  ;;  %v1130_v27 = vmul.f32 %v2144_v54, %v1114_v7  ;;  %v2420_v21 = vld [vmem:[#allocation30_spill] sm:$0xff]  ;;  %v2421_v4 = vld [vmem:[#allocation31_spill] sm:$0xff] }
 0x11c   :  { %v1133_v63 = vadd.f32 2.8329768, %v1117_v16  ;;  %v1134_v29 = vadd.f32 2.8329768, %v1118_v48  ;;  %v1135_v25 = vadd.f32 2.8329768, %v1119_v57 }
 0x11d   :  { %v1136_v40 = vadd.f32 2.8329768, %v1120_v36  ;;  %v1137_v52 = vadd.f32 2.8329768, %v1121_v22  ;;  %v1138_v18 = vadd.f32 2.8329768, %v1122_v62 }
 0x11e   :  { %v1139_v47 = vadd.f32 2.8329768, %v1123_v13  ;;  %v1140_v24 = vadd.f32 2.8329768, %v1124_v20  ;;  %v1141_v23 = vadd.f32 2.8329768, %v1125_v8 }
 0x11f   :  { %v1142_v41 = vadd.f32 2.8329768, %v1126_v50  ;;  %v1143_v15 = vadd.f32 2.8329768, %v1127_v31  ;;  %v1144_v12 = vadd.f32 2.8329768, %v1128_v46 }
 0x120   :  { %v1145_v2 = vadd.f32 2.8329768, %v1129_v32  ;;  %v1146_v53 = vadd.f32 2.8329768, %v1130_v27  ;;  %vm1147_vm0 = vcmp.lt.f32.partialorder %v1694_v51, 5.0  ;;  %vm1148_vm1 = vcmp.lt.f32.partialorder %v1696_v55, 5.0 }
 0x121   :  { %vm1149_vm2 = vcmp.lt.f32.partialorder %v1698_v56, 5.0  ;;  %vm1150_vm3 = vcmp.lt.f32.partialorder %v1700_v60, 5.0  ;;  %vm1151_vm4 = vcmp.lt.f32.partialorder %v1708_v14, 5.0  ;;  %vm1152_vm5 = vcmp.lt.f32.partialorder %v1710_v19, 5.0  ;;  %v2422_v54 = vld [vmem:[#allocation32_spill] sm:$0xff]  ;;  %v2431_v42 = vld [vmem:[#allocation41_spill] sm:$0xff] }
 0x122   :  { %vm1153_vm6 = vcmp.lt.f32.partialorder %v1718_v30, 5.0  ;;  %vm1154_vm7 = vcmp.lt.f32.partialorder %v1720_v34, 5.0  ;;  %vm1155_vm8 = vcmp.lt.f32.partialorder %v1722_v35, 5.0  ;;  %vm1156_vm9 = vcmp.lt.f32.partialorder %v1724_v38, 5.0  ;;  %v2432_v58 = vld [vmem:[#allocation42_spill] sm:$0xff]  ;;  %v2433_v6 = vld [vmem:[#allocation43_spill] sm:$0xff] }
 0x123   :  { %vm1157_vm10 = vcmp.lt.f32.partialorder %v1726_v39, 5.0  ;;  %vm1158_vm11 = vcmp.lt.f32.partialorder %v2415_v10, 5.0  ;;  %vm1159_vm12 = vcmp.lt.f32.partialorder %v2416_v11, 5.0  ;;  %vm1160_vm13 = vcmp.lt.f32.partialorder %v2417_v43, 5.0  ;;  %v2434_v7 = vld [vmem:[#allocation44_spill] sm:$0xff]  ;;  %v2435_v48 = vld [vmem:[#allocation45_spill] sm:$0xff] }
 0x124   :  { %vm1161_vm14 = vcmp.lt.f32.partialorder %v2420_v21, 5.0  ;;  %vm1162_vm15 = vcmp.lt.f32.partialorder %v2421_v4, 5.0  ;;  %v1163_v45 = vsel %vm1147_vm0, %v2422_v54, %v1131_v28  ;;  %v1164_v49 = vsel %vm1148_vm1, %v2423_v0, %v1132_v9  ;;  %v2436_v22 = vld [vmem:[#allocation46_spill] sm:$0xff]  ;;  %v2437_v20 = vld [vmem:[#allocation47_spill] sm:$0xff]  ;;  %v2447_v0 = vld [vmem:[#allocation20_spill] sm:$0xff] }
 0x125   :  { %v1165_v59 = vsel %vm1149_vm2, %v2424_v1, %v1133_v63  ;;  %v1166_v44 = vsel %vm1150_vm3, %v2425_v3, %v1134_v29  ;;  %v1167_v17 = vsel %vm1151_vm4, %v2426_v26, %v1135_v25  ;;  %v1168_v51 = vsel %vm1152_vm5, %v2427_v61, %v1136_v40  ;;  %v2438_v27 = vld [vmem:[#allocation11_spill] sm:$0xff]  ;;  %v2439_v29 = vld [vmem:[#allocation12_spill] sm:$0xff]  ;;  %v2445_v21 = vld [vmem:[#allocation18_spill] sm:$0xff] }
 0x126   :  { %v1169_v55 = vsel %vm1153_vm6, %v2428_v37, %v1137_v52  ;;  %v1170_v56 = vsel %vm1154_vm7, %v2429_v5, %v1138_v18  ;;  %v1171_v60 = vsel %vm1155_vm8, %v2430_v33, %v1139_v47  ;;  %v1172_v14 = vsel %vm1156_vm9, %v2431_v42, %v1140_v24  ;;  %v2440_v52 = vld [vmem:[#allocation13_spill] sm:$0xff]  ;;  %v2441_v47 = vld [vmem:[#allocation14_spill] sm:$0xff]  ;;  %v2446_v54 = vld [vmem:[#allocation19_spill] sm:$0xff] }
 0x127   :  { %v1173_v19 = vsel %vm1157_vm10, %v2432_v58, %v1141_v23  ;;  %v1174_v30 = vsel %vm1158_vm11, %v2433_v6, %v1142_v41  ;;  %v1175_v34 = vsel %vm1159_vm12, %v2434_v7, %v1143_v15  ;;  %v1179_v16 = vmul.f32 1.4142135, %v1163_v45  ;;  %v2442_v23 = vld [vmem:[#allocation15_spill] sm:$0xff]  ;;  %v2443_v15 = vld [vmem:[#allocation16_spill] sm:$0xff]  ;;  %v2448_v1 = vld [vmem:[#allocation21_spill] sm:$0xff] }
 0x128   :  { %v1176_v35 = vsel %vm1160_vm13, %v2435_v48, %v1144_v12  ;;  %v1180_v57 = vmul.f32 1.4142135, %v1164_v49  ;;  %v1181_v38 = vmul.f32 1.4142135, %v1165_v59  ;;  %v1182_v36 = vmul.f32 1.4142135, %v1166_v44 }
 0x129   :  { %v1177_v39 = vsel %vm1161_vm14, %v2436_v22, %v1145_v2  ;;  %v1183_v62 = vmul.f32 1.4142135, %v1167_v17  ;;  %v1184_v13 = vmul.f32 1.4142135, %v1168_v51  ;;  %v1185_v10 = vmul.f32 1.4142135, %v1169_v55 }
 0x12a   :  { %v1178_v11 = vsel %vm1162_vm15, %v2437_v20, %v1146_v53  ;;  %v1186_v8 = vmul.f32 1.4142135, %v1170_v56  ;;  %v1187_v50 = vmul.f32 1.4142135, %v1171_v60  ;;  %v1188_v31 = vmul.f32 1.4142135, %v1172_v14 }
 0x12b   :  { %v1189_v46 = vmul.f32 1.4142135, %v1173_v19  ;;  %v1190_v43 = vmul.f32 1.4142135, %v1174_v30  ;;  %v1191_v32 = vmul.f32 1.4142135, %v1175_v34  ;;  %v1195_v63 = vmul.f32 %v2438_v27, %v1179_v16 }
 0x12c   :  { %v1192_v28 = vmul.f32 1.4142135, %v1176_v35  ;;  %v1193_v9 = vmul.f32 1.4142135, %v1177_v39  ;;  %v1196_v25 = vmul.f32 %v2439_v29, %v1180_v57  ;;  %v1194_v40 = vmul.f32 1.4142135, %v1178_v11 }
 0x12d   :  { %v1197_v18 = vmul.f32 %v2440_v52, %v1181_v38  ;;  %v1198_v24 = vmul.f32 %v2441_v47, %v1182_v36  ;;  %v1199_v41 = vmul.f32 %v2442_v23, %v1183_v62  ;;  %v1200_v12 = vmul.f32 %v2443_v15, %v1184_v13  ;;  %v2444_v2 = vld [vmem:[#allocation17_spill] sm:$0xff]  ;;  %v2449_v3 = vld [vmem:[#allocation22_spill] sm:$0xff]  ;;  %v2450_v26 = vld [vmem:[#allocation23_spill] sm:$0xff] }
 0x12e   :  { %v1201_v53 = vmul.f32 %v2444_v2, %v1185_v10  ;;  %v1202_v4 = vmul.f32 %v2445_v21, %v1186_v8  ;;  %v1203_v45 = vmul.f32 %v2446_v54, %v1187_v50  ;;  %v1204_v49 = vmul.f32 %v2447_v0, %v1188_v31  ;;  %v2451_v61 = vld [vmem:[#allocation24_spill] sm:$0xff]  ;;  %v2452_v37 = vld [vmem:[#allocation25_spill] sm:$0xff]  ;;  %v2453_v33 = vld [vmem:[#allocation26_spill] sm:$0xff] }
 0x12f   :  { %v1205_v59 = vmul.f32 %v2448_v1, %v1189_v46  ;;  %v1206_v44 = vmul.f32 %v2449_v3, %v1190_v43  ;;  %v1207_v17 = vmul.f32 %v2450_v26, %v1191_v32  ;;  %v1208_v51 = vmul.f32 %v2451_v61, %v1192_v28 }
 0x130   :  { %v1209_v55 = vmul.f32 %v2452_v37, %v1193_v9  ;;  %v1211_v5 = vmul.f32 1.3498588, %v1195_v63  ;;  %v1212_v56 = vmul.f32 1.3498588, %v1196_v25  ;;  %v1210_v60 = vmul.f32 %v2453_v33, %v1194_v40 }
 0x131   :  { %v1213_v42 = vmul.f32 1.3498588, %v1197_v18  ;;  %v1214_v14 = vmul.f32 1.3498588, %v1198_v24  ;;  %v1215_v58 = vmul.f32 1.3498588, %v1199_v41 }
 0x132   :  { %v1216_v19 = vmul.f32 1.3498588, %v1200_v12  ;;  %v1217_v6 = vmul.f32 1.3498588, %v1201_v53  ;;  %v1218_v30 = vmul.f32 1.3498588, %v1202_v4 }
 0x133   :  { %v1219_v7 = vmul.f32 1.3498588, %v1203_v45  ;;  %v1220_v34 = vmul.f32 1.3498588, %v1204_v49  ;;  %v1221_v16 = vmul.f32 1.3498588, %v1205_v59 }
 0x134   :  { %v1222_v48 = vmul.f32 1.3498588, %v1206_v44  ;;  %v1223_v35 = vmul.f32 1.3498588, %v1207_v17  ;;  %v1224_v57 = vmul.f32 1.3498588, %v1208_v51 }
 0x135   :  { %v1225_v38 = vmul.f32 1.3498588, %v1209_v55  ;;  %v1226_v36 = vmul.f32 1.3498588, %v1210_v60  ;;  %v1227_v22 = vadd.f32 1.0, %v1211_v5  ;;  %v1228_v39 = vadd.f32 1.0, %v1212_v56 }
 0x136   :  { %v1229_v62 = vadd.f32 1.0, %v1213_v42  ;;  %v1230_v13 = vadd.f32 1.0, %v1214_v14  ;;  %v1231_v10 = vadd.f32 1.0, %v1215_v58  ;;  %v1232_v20 = vadd.f32 1.0, %v1216_v19  ;;  %v2454_v12 = vld [vmem:[#allocation10_spill] sm:$0xff]  ;;  %v1244_v5 = vld [vmem:[#allocation4 + $0x8] sm:$0xff] }
 0x137   :  { %v1233_v11 = vadd.f32 1.0, %v1217_v6  ;;  %v1234_v8 = vadd.f32 1.0, %v1218_v30  ;;  %v1235_v50 = vadd.f32 1.0, %v1219_v7  ;;  %v1236_v31 = vadd.f32 1.0, %v1220_v34  ;;  %v1243_v51 = vld [vmem:[#allocation4] sm:$0xff] }
 0x138   :  { %v1237_v46 = vadd.f32 1.0, %v1221_v16  ;;  %v1238_v43 = vadd.f32 1.0, %v1222_v48  ;;  %v1239_v32 = vadd.f32 1.0, %v1223_v35  ;;  %v1240_v28 = vadd.f32 1.0, %v1224_v57 }
 0x139   :  { %v1241_v9 = vadd.f32 1.0, %v1225_v38  ;;  %v1242_v27 = vadd.f32 1.0, %v1226_v36  ;;  %v1604_v63 = vmov 1966171168   ;;  %v1261_v25 = vcombine.low %v1227_v22, %v1228_v39 }
 0x13a   :  { %v1266_v29 = vunpack.c.l.s4 %v1604_v63  ;;  %v1262_v40 = vcombine.low %v1229_v62, %v1230_v13  ;;  %v1263_v52 = vcombine.low %v1231_v10, %v1232_v20  ;;  %v1264_v18 = vcombine.low %v1233_v11, %v1234_v8 }
 0x13b   :  { %v1310_v24 = vcombine.low %v1235_v50, %v1236_v31  ;;  %v1311_v23 = vcombine.low %v1237_v46, %v1238_v43  ;;  %v1312_v41 = vcombine.low %v1239_v32, %v1240_v28  ;;  %v1313_v15 = vcombine.low %v1241_v9, %v1242_v27 }
 0x13c   :  { %v1267_v47 = vunpack.c.0.s8 %v1266_v29 }
 0x13e   :  { %v1270_v2 = vsub.s32 %v1267_v47, %v2454_v12 }
 0x140   :  { %v1271_v53 = vrot.slane %v1261_v25, %v1270_v2  ;;  %v1278_v21 = vrot.slane %v1262_v40, %v1270_v2  ;;  %v1285_v4 = vrot.slane %v1263_v52, %v1270_v2  ;;  %v1292_v54 = vrot.slane %v1264_v18, %v1270_v2 }
 0x141   :  { %v1320_v45 = vrot.slane %v1310_v24, %v1270_v2  ;;  %v1327_v0 = vrot.slane %v1311_v23, %v1270_v2  ;;  %v1334_v49 = vrot.slane %v1312_v41, %v1270_v2  ;;  %v1341_v1 = vrot.slane %v1313_v15, %v1270_v2 }
 0x142   :  { %v1293_v59 = vcombine.low %v1271_v53, %v1278_v21  ;;  %v1294_v3 = vcombine.low %v1285_v4, %v1292_v54 }
 0x143   :  { %v1342_v44 = vcombine.low %v1320_v45, %v1327_v0  ;;  %v1343_v26 = vcombine.low %v1334_v49, %v1341_v1 }
 0x144   :  { %v1301_v17 = vrot.slane %v1293_v59, %v1270_v2  ;;  %v1308_v61 = vrot.slane %v1294_v3, %v1270_v2 }
 0x145   :  { %v1350_v37 = vrot.slane %v1342_v44, %v1270_v2  ;;  %v1357_v55 = vrot.slane %v1343_v26, %v1270_v2 }
 0x146   :  { %v1309_v56 = vcombine.low %v1301_v17, %v1308_v61 }
 0x147   :  { %v1358_v33 = vcombine.low %v1350_v37, %v1357_v55 }
 0x148   :  { %v1361_v60 = vmul.f32 %v1309_v56, %v1243_v51 }
 0x149   :  { %v1362_v42 = vmul.f32 %v1358_v33, %v1244_v5 }
 0x14a   :  { %1363 = vst [vmem:[#allocation7] sm:$0xff] %v1361_v60 }
 0x14b   :  { %1364 = vst [vmem:[#allocation7 + $0x8] sm:$0xff] %v1362_v42 }
 0x14c   :  { %1590 = shalt.err (!%p1587_p9)
}
 0x14d   :  { %1374 = dma.vmem_to_hbm [thread:$0]  %s1372_s27, 256, %s2347_s2, [#allocation6]  }
 0x14e   :  { %1601 = dma.done.wait [#allocation6], 256  }
 0x14f   :  { %1602 = vsyncadd [#allocation6], 4294967040 }
 0x150   :  { %1378 = vsyncpa [#allocation5], 1 }
 0x151   :  { %1379 = vsyncpa [#allocation6], 1 }

</bundles_post_ra>
